<compile_context>
chip_gen: v7x
topology: tpu7x:2x2x1
jax: 0.10.0
libtpu: 0.0.40
codegen_flags: <defaults>
</compile_context>

<pallas_src>
import jax
import jax.numpy as jnp
from jax.experimental import pallas as pl
from jax.experimental.pallas import tpu as pltpu

SEQ_LEN = 22                     # conv(5) -> 18, avgpool(2) -> 9, 9 * 80 = 720
KSIZE = 5
IN_CH = 4
CONV_CH = 80
CONV_OUT = SEQ_LEN - KSIZE + 1   # 18
POOL_OUT = CONV_OUT // 2         # 9
FEAT = IN_CH * SEQ_LEN           # 88 raw features per sample (c*22 + t order)
CONV_COLS = CONV_OUT * CONV_CH   # 1440 conv-map columns (t*80 + o order)
N_CHUNKS = 3
CHUNK = 512
CONV_COLS_PAD = N_CHUNKS * CHUNK # 1536 (zero-padded tail columns)
OUT_ROWS = 8                     # transposed output rows (row 0 is the result)


def regression_kernel(x_ref, wc_ref, bc_ref, w1_ref, b1_ref,
                      w2_ref, b2_ref, w3_ref, b3_ref, w4_ref, b4_ref,
                      out_ref):
    # x_ref  : (TB, 88)       raw NCW-flattened inputs
    # wc_ref : (3, 88, 512)   block-structured conv weight (column chunks)
    # bc_ref : (3, 1, 512)    conv bias tiled over the 18 positions (chunked)
    # w1_ref : (3, 512, 80)   fused avgpool + Linear(720,80) weight (row chunks)
    # out_ref: (8, TB)        row 0 holds the regression output
    x = x_ref[...]                                            # (TB, 88)

    # Conv1d(4->80,k=5) + ReLU fused with AvgPool1d(2) + Linear(720->80),
    # accumulated over 3 column chunks of the padded 1536-wide conv map.
    # TODO(synk): nn.Dropout(p=0.3) layers are identity (inference); no RNG applied.
    acc = None
    for j in range(N_CHUNKS):
        h = jnp.maximum(
            jnp.dot(x, wc_ref[j], preferred_element_type=jnp.float32)
            + bc_ref[j], 0.0)                                 # (TB, 512)
        p = jnp.dot(h, w1_ref[j], preferred_element_type=jnp.float32)
        acc = p if acc is None else acc + p                   # (TB, 80)
    z1 = jnp.maximum(acc + b1_ref[...], 0.0)                  # (TB, 80)

    z2 = jnp.maximum(
        jnp.dot(z1, w2_ref[...], preferred_element_type=jnp.float32)
        + b2_ref[...], 0.0)                                   # (TB, 40)
    z3 = jnp.maximum(
        jnp.dot(z2, w3_ref[...], preferred_element_type=jnp.float32)
        + b3_ref[...], 0.0)                                   # (TB, 40)
    # Linear(40 -> 1) computed transposed: (8,40) x (TB,40)^T -> (8, TB),
    # so the output store is a lane-dense (8, TB) block.
    out_ref[...] = jax.lax.dot_general(
        w4_ref[...], z3, (((1,), (1,)), ((), ())),
        preferred_element_type=jnp.float32) + b4_ref[...]


def init_params(key):
    """Deterministic synthetic weights in PyTorch shapes."""
    ks = jax.random.split(key, 10)
    s = 0.1
    Wc = jax.random.normal(ks[0], (CONV_CH, IN_CH, KSIZE), jnp.float32) * s
    bc = jax.random.normal(ks[1], (CONV_CH,), jnp.float32) * s
    W1 = jax.random.normal(ks[2], (80, CONV_CH * POOL_OUT), jnp.float32) * s
    b1 = jax.random.normal(ks[3], (80,), jnp.float32) * s
    W2 = jax.random.normal(ks[4], (40, 80), jnp.float32) * s
    b2 = jax.random.normal(ks[5], (40,), jnp.float32) * s
    W3 = jax.random.normal(ks[6], (40, 40), jnp.float32) * s
    b3 = jax.random.normal(ks[7], (40,), jnp.float32) * s
    W4 = jax.random.normal(ks[8], (1, 40), jnp.float32) * s
    b4 = jax.random.normal(ks[9], (1,), jnp.float32) * s
    return (Wc, bc, W1, b1, W2, b2, W3, b3, W4, b4)


def _prepare_kernel_params(params):
    """Fold conv / pool / flatten structure into MXU-friendly big weights."""
    Wc, bc, W1, b1, W2, b2, W3, b3, W4, b4 = params

    # Block-structured conv weight over the raw NCW flatten:
    #   WcBig[c*22 + ti, t*80 + o] = Wc[o, c, ti - t]  if 0 <= ti - t < 5 else 0
    ti = jnp.arange(SEQ_LEN)[:, None]                 # (22, 1)
    tt = jnp.arange(CONV_OUT)[None, :]                # (1, 18)
    k = ti - tt                                       # (22, 18)
    valid = ((k >= 0) & (k < KSIZE)).astype(jnp.float32)
    kc = jnp.clip(k, 0, KSIZE - 1)
    Wg = Wc[:, :, kc] * valid[None, None]             # (80, 4, 22, 18)
    WcBig = jnp.transpose(Wg, (1, 2, 3, 0)).reshape(FEAT, CONV_COLS)
    WcBig = jnp.pad(WcBig, ((0, 0), (0, CONV_COLS_PAD - CONV_COLS)))
    wc3 = WcBig.reshape(FEAT, N_CHUNKS, CHUNK).transpose(1, 0, 2)   # (3, 88, 512)

    bcBig = jnp.pad(jnp.tile(bc, CONV_OUT), (0, CONV_COLS_PAD - CONV_COLS))
    bc3 = bcBig.reshape(N_CHUNKS, 1, CHUNK)                          # (3, 1, 512)

    # Fused AvgPool1d(2) + PyTorch channel-major Flatten + Linear(720, 80):
    #   W1Big[t*80 + o, m] = 0.5 * W1[m, o*9 + t//2]   (0.5 pooling factor, exact)
    W1r = W1.reshape(80, CONV_CH, POOL_OUT)                          # [m, o, l]
    W1g = W1r[:, :, jnp.arange(CONV_OUT) // 2]                       # [m, o, t]
    W1Big = 0.5 * jnp.transpose(W1g, (2, 1, 0)).reshape(CONV_COLS, 80)
    W1Big = jnp.pad(W1Big, ((0, CONV_COLS_PAD - CONV_COLS), (0, 0)))
    w13 = W1Big.reshape(N_CHUNKS, CHUNK, 80)                         # (3, 512, 80)

    b1r = b1.reshape(1, 80)
    w2 = W2.T                                                        # (80, 40)
    b2r = b2.reshape(1, 40)
    w3 = W3.T                                                        # (40, 40)
    b3r = b3.reshape(1, 40)
    # Final Linear(40 -> 1), transposed and zero-padded to 8 output rows.
    w4p = jnp.zeros((OUT_ROWS, 40), jnp.float32).at[0].set(W4[0])
    b4p = jnp.zeros((OUT_ROWS, 1), jnp.float32).at[0, 0].set(b4[0])
    return (wc3, bc3, w13, b1r, w2, b2r, w3, b3r, w4p, b4p)


def _round_up(x, m):
    return ((x + m - 1) // m) * m


def _choose_tb(n):
    if n < 256:
        return max(8, _round_up(n, 8))            # single block
    # >= 2 blocks (feeds both v7x TensorCores over the "parallel" axis) and a
    # 128-multiple TB so the transposed (8, TB) output store is lane-dense.
    return min(1024, _round_up(pl.cdiv(n, 2), 128))


def _full_spec(arr):
    nd = arr.ndim
    return pl.BlockSpec(arr.shape, lambda i, _nd=nd: (0,) * _nd)


def regression_forward(x_ncw, params, tb=None):
    """x_ncw: (N, 4, 22) float32 in PyTorch NCW layout. Returns (N,)."""
    N = x_ncw.shape[0]
    if tb is None:
        tb = _choose_tb(N)
    n_blocks = pl.cdiv(N, tb)
    n_pad = n_blocks * tb

    # Raw NCW flatten (feature = c*22 + t): a free reshape, no im2col slab.
    xf = x_ncw.astype(jnp.float32).reshape(N, FEAT)
    if n_pad != N:
        xf = jnp.pad(xf, ((0, n_pad - N), (0, 0)))

    kparams = _prepare_kernel_params(params)
    in_specs = [pl.BlockSpec((tb, FEAT), lambda i: (i, 0))]
    in_specs += [_full_spec(p) for p in kparams]

    out = pl.pallas_call(
        regression_kernel,
        out_shape=jax.ShapeDtypeStruct((OUT_ROWS, n_pad), jnp.float32),
        grid=(n_blocks,),
        in_specs=in_specs,
        out_specs=pl.BlockSpec((OUT_ROWS, tb), lambda i: (0, i)),
        compiler_params=pltpu.CompilerParams(
            dimension_semantics=("parallel",),
            vmem_limit_bytes=32 * 1024 * 1024),
    )(xf, *kparams)
    return out[0, :N]                              # == squeeze(1)


def reference_forward(x_ncw, params):
    """Plain-JAX reference with PyTorch semantics (correctness check)."""
    Wc, bc, W1, b1, W2, b2, W3, b3, W4, b4 = params
    hp = jax.lax.Precision.HIGHEST
    x = x_ncw.astype(jnp.float32)                                    # (N, 4, 22)
    N = x.shape[0]
    h = jnp.zeros((N, CONV_CH, CONV_OUT), jnp.float32)
    for k in range(KSIZE):
        h = h + jnp.einsum('nct,oc->not', x[:, :, k:k + CONV_OUT], Wc[:, :, k],
                           precision=hp)
    h = jnp.maximum(h + bc[None, :, None], 0.0)                      # (N, 80, 18)
    pooled = 0.5 * (h[:, :, 0::2] + h[:, :, 1::2])                   # (N, 80, 9)
    flat = pooled.reshape(N, CONV_CH * POOL_OUT)                     # channel-major
    z1 = jnp.maximum(jnp.dot(flat, W1.T, precision=hp) + b1, 0.0)
    z2 = jnp.maximum(jnp.dot(z1, W2.T, precision=hp) + b2, 0.0)
    z3 = jnp.maximum(jnp.dot(z2, W3.T, precision=hp) + b3, 0.0)
    return (jnp.dot(z3, W4.T, precision=hp) + b4).reshape(-1)


if __name__ == "__main__":
    key = jax.random.PRNGKey(0)
    kx, kp = jax.random.split(key)
    params = init_params(kp)
    fwd = jax.jit(regression_forward)

    # Small test (single block).
    x = jax.random.normal(kx, (2, IN_CH, SEQ_LEN), jnp.float32)      # (N=2, C=4, L=22)
    out = jax.block_until_ready(fwd(x, params))
    ref = jax.block_until_ready(reference_forward(x, params))
    assert out.shape == (2,), out.shape
    assert jnp.allclose(out, ref, atol=1e-3, rtol=1e-3), (out, ref)

    # Batched test (two parallel grid blocks + padded tail).
    x2 = jax.random.normal(jax.random.fold_in(kx, 1), (300, IN_CH, SEQ_LEN),
                           jnp.float32)
    out2 = jax.block_until_ready(fwd(x2, params))
    ref2 = jax.block_until_ready(reference_forward(x2, params))
    assert out2.shape == (300,), out2.shape
    assert jnp.allclose(out2, ref2, atol=1e-3, rtol=1e-3)

    print("KERNEL_OK")
</pallas_src>

<mosaic_0001>
module attributes {stable_mosaic.version = 11 : i64} {
  func.func @regression_kernel(%arg0: i32, %arg1: memref<8x88xf32, #tpu.memory_space<vmem>>, %arg2: memref<3x88x512xf32, #tpu.memory_space<vmem>>, %arg3: memref<3x1x512xf32, #tpu.memory_space<vmem>>, %arg4: memref<3x512x80xf32, #tpu.memory_space<vmem>>, %arg5: memref<1x80xf32, #tpu.memory_space<vmem>>, %arg6: memref<80x40xf32, #tpu.memory_space<vmem>>, %arg7: memref<1x40xf32, #tpu.memory_space<vmem>>, %arg8: memref<40x40xf32, #tpu.memory_space<vmem>>, %arg9: memref<1x40xf32, #tpu.memory_space<vmem>>, %arg10: memref<8x40xf32, #tpu.memory_space<vmem>>, %arg11: memref<8x1xf32, #tpu.memory_space<vmem>>, %arg12: memref<8x8xf32, #tpu.memory_space<vmem>>) attributes {dimension_semantics = [#tpu.dimension_semantics<parallel>], iteration_bounds = array<i64: 1>, scalar_prefetch = 0 : i64, scratch_operands = 0 : i64, tpu.core_type = #tpu.core_type<tc>, window_params = [{transform_indices = @transform_0, window_bounds = array<i64: 8, 88>}, {pipeline_mode = #tpu.pipeline_mode<synchronous>, transform_indices = @transform_1, window_bounds = array<i64: 3, 88, 512>}, {pipeline_mode = #tpu.pipeline_mode<synchronous>, transform_indices = @transform_2, window_bounds = array<i64: 3, 1, 512>}, {pipeline_mode = #tpu.pipeline_mode<synchronous>, transform_indices = @transform_3, window_bounds = array<i64: 3, 512, 80>}, {pipeline_mode = #tpu.pipeline_mode<synchronous>, transform_indices = @transform_4, window_bounds = array<i64: 1, 80>}, {pipeline_mode = #tpu.pipeline_mode<synchronous>, transform_indices = @transform_5, window_bounds = array<i64: 80, 40>}, {pipeline_mode = #tpu.pipeline_mode<synchronous>, transform_indices = @transform_6, window_bounds = array<i64: 1, 40>}, {pipeline_mode = #tpu.pipeline_mode<synchronous>, transform_indices = @transform_7, window_bounds = array<i64: 40, 40>}, {pipeline_mode = #tpu.pipeline_mode<synchronous>, transform_indices = @transform_8, window_bounds = array<i64: 1, 40>}, {pipeline_mode = #tpu.pipeline_mode<synchronous>, transform_indices = @transform_9, window_bounds = array<i64: 8, 40>}, {pipeline_mode = #tpu.pipeline_mode<synchronous>, transform_indices = @transform_10, window_bounds = array<i64: 8, 1>}, {transform_indices = @transform_11, window_bounds = array<i64: 8, 8>}]} {
    %c0 = arith.constant 0 : index
    %c0_0 = arith.constant 0 : index
    %0 = vector.load %arg1[%c0, %c0_0] : memref<8x88xf32, #tpu.memory_space<vmem>>, vector<8x88xf32>
    %c0_1 = arith.constant 0 : index
    %c0_2 = arith.constant 0 : index
    %c0_3 = arith.constant 0 : index
    %1 = vector.load %arg2[%c0_1, %c0_2, %c0_3] : memref<3x88x512xf32, #tpu.memory_space<vmem>>, vector<1x88x512xf32>
    %2 = vector.shape_cast %1 : vector<1x88x512xf32> to vector<88x512xf32>
    %cst = arith.constant dense<0.000000e+00> : vector<8x512xf32>
    %3 = tpu.matmul %0, %2, %cst {dimension_numbers = #tpu.dot_dimension_numbers<[1], [0], [0], [1], [0, 0, 1, 1], [], []>} : vector<8x88xf32>, vector<88x512xf32>, vector<8x512xf32> -> vector<8x512xf32>
    %c0_4 = arith.constant 0 : index
    %c0_5 = arith.constant 0 : index
    %c0_6 = arith.constant 0 : index
    %4 = vector.load %arg3[%c0_4, %c0_5, %c0_6] : memref<3x1x512xf32, #tpu.memory_space<vmem>>, vector<1x1x512xf32>
    %5 = vector.shape_cast %4 : vector<1x1x512xf32> to vector<1x512xf32>
    %6 = vector.broadcast %5 : vector<1x512xf32> to vector<8x512xf32>
    %7 = arith.addf %3, %6 : vector<8x512xf32>
    %cst_7 = arith.constant 0.000000e+00 : f32
    %8 = vector.broadcast %cst_7 : f32 to vector<8x512xf32>
    %9 = arith.maximumf %7, %8 : vector<8x512xf32>
    %c0_8 = arith.constant 0 : index
    %c0_9 = arith.constant 0 : index
    %c0_10 = arith.constant 0 : index
    %10 = vector.load %arg4[%c0_8, %c0_9, %c0_10] : memref<3x512x80xf32, #tpu.memory_space<vmem>>, vector<1x512x80xf32>
    %11 = vector.shape_cast %10 : vector<1x512x80xf32> to vector<512x80xf32>
    %cst_11 = arith.constant dense<0.000000e+00> : vector<8x80xf32>
    %12 = tpu.matmul %9, %11, %cst_11 {dimension_numbers = #tpu.dot_dimension_numbers<[1], [0], [0], [1], [0, 0, 1, 1], [], []>} : vector<8x512xf32>, vector<512x80xf32>, vector<8x80xf32> -> vector<8x80xf32>
    %c1 = arith.constant 1 : index
    %c0_12 = arith.constant 0 : index
    %c0_13 = arith.constant 0 : index
    %13 = vector.load %arg2[%c1, %c0_12, %c0_13] : memref<3x88x512xf32, #tpu.memory_space<vmem>>, vector<1x88x512xf32>
    %14 = vector.shape_cast %13 : vector<1x88x512xf32> to vector<88x512xf32>
    %cst_14 = arith.constant dense<0.000000e+00> : vector<8x512xf32>
    %15 = tpu.matmul %0, %14, %cst_14 {dimension_numbers = #tpu.dot_dimension_numbers<[1], [0], [0], [1], [0, 0, 1, 1], [], []>} : vector<8x88xf32>, vector<88x512xf32>, vector<8x512xf32> -> vector<8x512xf32>
    %c1_15 = arith.constant 1 : index
    %c0_16 = arith.constant 0 : index
    %c0_17 = arith.constant 0 : index
    %16 = vector.load %arg3[%c1_15, %c0_16, %c0_17] : memref<3x1x512xf32, #tpu.memory_space<vmem>>, vector<1x1x512xf32>
    %17 = vector.shape_cast %16 : vector<1x1x512xf32> to vector<1x512xf32>
    %18 = vector.broadcast %17 : vector<1x512xf32> to vector<8x512xf32>
    %19 = arith.addf %15, %18 : vector<8x512xf32>
    %cst_18 = arith.constant 0.000000e+00 : f32
    %20 = vector.broadcast %cst_18 : f32 to vector<8x512xf32>
    %21 = arith.maximumf %19, %20 : vector<8x512xf32>
    %c1_19 = arith.constant 1 : index
    %c0_20 = arith.constant 0 : index
    %c0_21 = arith.constant 0 : index
    %22 = vector.load %arg4[%c1_19, %c0_20, %c0_21] : memref<3x512x80xf32, #tpu.memory_space<vmem>>, vector<1x512x80xf32>
    %23 = vector.shape_cast %22 : vector<1x512x80xf32> to vector<512x80xf32>
    %cst_22 = arith.constant dense<0.000000e+00> : vector<8x80xf32>
    %24 = tpu.matmul %21, %23, %cst_22 {dimension_numbers = #tpu.dot_dimension_numbers<[1], [0], [0], [1], [0, 0, 1, 1], [], []>} : vector<8x512xf32>, vector<512x80xf32>, vector<8x80xf32> -> vector<8x80xf32>
    %25 = arith.addf %12, %24 : vector<8x80xf32>
    %c2 = arith.constant 2 : index
    %c0_23 = arith.constant 0 : index
    %c0_24 = arith.constant 0 : index
    %26 = vector.load %arg2[%c2, %c0_23, %c0_24] : memref<3x88x512xf32, #tpu.memory_space<vmem>>, vector<1x88x512xf32>
    %27 = vector.shape_cast %26 : vector<1x88x512xf32> to vector<88x512xf32>
    %cst_25 = arith.constant dense<0.000000e+00> : vector<8x512xf32>
    %28 = tpu.matmul %0, %27, %cst_25 {dimension_numbers = #tpu.dot_dimension_numbers<[1], [0], [0], [1], [0, 0, 1, 1], [], []>} : vector<8x88xf32>, vector<88x512xf32>, vector<8x512xf32> -> vector<8x512xf32>
    %c2_26 = arith.constant 2 : index
    %c0_27 = arith.constant 0 : index
    %c0_28 = arith.constant 0 : index
    %29 = vector.load %arg3[%c2_26, %c0_27, %c0_28] : memref<3x1x512xf32, #tpu.memory_space<vmem>>, vector<1x1x512xf32>
    %30 = vector.shape_cast %29 : vector<1x1x512xf32> to vector<1x512xf32>
    %31 = vector.broadcast %30 : vector<1x512xf32> to vector<8x512xf32>
    %32 = arith.addf %28, %31 : vector<8x512xf32>
    %cst_29 = arith.constant 0.000000e+00 : f32
    %33 = vector.broadcast %cst_29 : f32 to vector<8x512xf32>
    %34 = arith.maximumf %32, %33 : vector<8x512xf32>
    %c2_30 = arith.constant 2 : index
    %c0_31 = arith.constant 0 : index
    %c0_32 = arith.constant 0 : index
    %35 = vector.load %arg4[%c2_30, %c0_31, %c0_32] : memref<3x512x80xf32, #tpu.memory_space<vmem>>, vector<1x512x80xf32>
    %36 = vector.shape_cast %35 : vector<1x512x80xf32> to vector<512x80xf32>
    %cst_33 = arith.constant dense<0.000000e+00> : vector<8x80xf32>
    %37 = tpu.matmul %34, %36, %cst_33 {dimension_numbers = #tpu.dot_dimension_numbers<[1], [0], [0], [1], [0, 0, 1, 1], [], []>} : vector<8x512xf32>, vector<512x80xf32>, vector<8x80xf32> -> vector<8x80xf32>
    %38 = arith.addf %25, %37 : vector<8x80xf32>
    %c0_34 = arith.constant 0 : index
    %c0_35 = arith.constant 0 : index
    %39 = vector.load %arg5[%c0_34, %c0_35] : memref<1x80xf32, #tpu.memory_space<vmem>>, vector<1x80xf32>
    %40 = vector.broadcast %39 : vector<1x80xf32> to vector<8x80xf32>
    %41 = arith.addf %38, %40 : vector<8x80xf32>
    %cst_36 = arith.constant 0.000000e+00 : f32
    %42 = vector.broadcast %cst_36 : f32 to vector<8x80xf32>
    %43 = arith.maximumf %41, %42 : vector<8x80xf32>
    %c0_37 = arith.constant 0 : index
    %c0_38 = arith.constant 0 : index
    %44 = vector.load %arg6[%c0_37, %c0_38] : memref<80x40xf32, #tpu.memory_space<vmem>>, vector<80x40xf32>
    %cst_39 = arith.constant dense<0.000000e+00> : vector<8x40xf32>
    %45 = tpu.matmul %43, %44, %cst_39 {dimension_numbers = #tpu.dot_dimension_numbers<[1], [0], [0], [1], [0, 0, 1, 1], [], []>} : vector<8x80xf32>, vector<80x40xf32>, vector<8x40xf32> -> vector<8x40xf32>
    %c0_40 = arith.constant 0 : index
    %c0_41 = arith.constant 0 : index
    %46 = vector.load %arg7[%c0_40, %c0_41] : memref<1x40xf32, #tpu.memory_space<vmem>>, vector<1x40xf32>
    %47 = vector.broadcast %46 : vector<1x40xf32> to vector<8x40xf32>
    %48 = arith.addf %45, %47 : vector<8x40xf32>
    %cst_42 = arith.constant 0.000000e+00 : f32
    %49 = vector.broadcast %cst_42 : f32 to vector<8x40xf32>
    %50 = arith.maximumf %48, %49 : vector<8x40xf32>
    %c0_43 = arith.constant 0 : index
    %c0_44 = arith.constant 0 : index
    %51 = vector.load %arg8[%c0_43, %c0_44] : memref<40x40xf32, #tpu.memory_space<vmem>>, vector<40x40xf32>
    %cst_45 = arith.constant dense<0.000000e+00> : vector<8x40xf32>
    %52 = tpu.matmul %50, %51, %cst_45 {dimension_numbers = #tpu.dot_dimension_numbers<[1], [0], [0], [1], [0, 0, 1, 1], [], []>} : vector<8x40xf32>, vector<40x40xf32>, vector<8x40xf32> -> vector<8x40xf32>
    %c0_46 = arith.constant 0 : index
    %c0_47 = arith.constant 0 : index
    %53 = vector.load %arg9[%c0_46, %c0_47] : memref<1x40xf32, #tpu.memory_space<vmem>>, vector<1x40xf32>
    %54 = vector.broadcast %53 : vector<1x40xf32> to vector<8x40xf32>
    %55 = arith.addf %52, %54 : vector<8x40xf32>
    %cst_48 = arith.constant 0.000000e+00 : f32
    %56 = vector.broadcast %cst_48 : f32 to vector<8x40xf32>
    %57 = arith.maximumf %55, %56 : vector<8x40xf32>
    %c0_49 = arith.constant 0 : index
    %c0_50 = arith.constant 0 : index
    %58 = vector.load %arg10[%c0_49, %c0_50] : memref<8x40xf32, #tpu.memory_space<vmem>>, vector<8x40xf32>
    %cst_51 = arith.constant dense<0.000000e+00> : vector<8x8xf32>
    %59 = tpu.matmul %58, %57, %cst_51 {dimension_numbers = #tpu.dot_dimension_numbers<[1], [1], [0], [0], [0, 0, 1, 0], [], []>} : vector<8x40xf32>, vector<8x40xf32>, vector<8x8xf32> -> vector<8x8xf32>
    %c0_52 = arith.constant 0 : index
    %c0_53 = arith.constant 0 : index
    %60 = vector.load %arg11[%c0_52, %c0_53] : memref<8x1xf32, #tpu.memory_space<vmem>>, vector<8x1xf32>
    %61 = vector.broadcast %60 : vector<8x1xf32> to vector<8x8xf32>
    %62 = arith.addf %59, %61 : vector<8x8xf32>
    %c0_54 = arith.constant 0 : index
    %c0_55 = arith.constant 0 : index
    %63 = vector.load %arg12[%c0_54, %c0_55] : memref<8x8xf32, #tpu.memory_space<vmem>>, vector<8x8xf32>
    tpu.vector_store %arg12[%c0_54, %c0_55], %62 {strides = array<i32>} : memref<8x8xf32, #tpu.memory_space<vmem>>, vector<8x8xf32>,
    return
  }
  func.func @transform_0(%arg0: i32) -> (i32, i32) {
    %c0_i32 = arith.constant 0 : i32
    %c0_i32_0 = arith.constant 0 : i32
    return %arg0, %c0_i32 : i32, i32
  }
  func.func @transform_1(%arg0: i32) -> (i32, i32, i32) {
    %c0_i32 = arith.constant 0 : i32
    %c0_i32_0 = arith.constant 0 : i32
    %c0_i32_1 = arith.constant 0 : i32
    %c0_i32_2 = arith.constant 0 : i32
    return %c0_i32, %c0_i32_0, %c0_i32_1 : i32, i32, i32
  }
  func.func @transform_2(%arg0: i32) -> (i32, i32, i32) {
    %c0_i32 = arith.constant 0 : i32
    %c0_i32_0 = arith.constant 0 : i32
    %c0_i32_1 = arith.constant 0 : i32
    %c0_i32_2 = arith.constant 0 : i32
    return %c0_i32, %c0_i32_0, %c0_i32_1 : i32, i32, i32
  }
  func.func @transform_3(%arg0: i32) -> (i32, i32, i32) {
    %c0_i32 = arith.constant 0 : i32
    %c0_i32_0 = arith.constant 0 : i32
    %c0_i32_1 = arith.constant 0 : i32
    %c0_i32_2 = arith.constant 0 : i32
    return %c0_i32, %c0_i32_0, %c0_i32_1 : i32, i32, i32
  }
  func.func @transform_4(%arg0: i32) -> (i32, i32) {
    %c0_i32 = arith.constant 0 : i32
    %c0_i32_0 = arith.constant 0 : i32
    %c0_i32_1 = arith.constant 0 : i32
    return %c0_i32, %c0_i32_0 : i32, i32
  }
  func.func @transform_5(%arg0: i32) -> (i32, i32) {
    %c0_i32 = arith.constant 0 : i32
    %c0_i32_0 = arith.constant 0 : i32
    %c0_i32_1 = arith.constant 0 : i32
    return %c0_i32, %c0_i32_0 : i32, i32
  }
  func.func @transform_6(%arg0: i32) -> (i32, i32) {
    %c0_i32 = arith.constant 0 : i32
    %c0_i32_0 = arith.constant 0 : i32
    %c0_i32_1 = arith.constant 0 : i32
    return %c0_i32, %c0_i32_0 : i32, i32
  }
  func.func @transform_7(%arg0: i32) -> (i32, i32) {
    %c0_i32 = arith.constant 0 : i32
    %c0_i32_0 = arith.constant 0 : i32
    %c0_i32_1 = arith.constant 0 : i32
    return %c0_i32, %c0_i32_0 : i32, i32
  }
  func.func @transform_8(%arg0: i32) -> (i32, i32) {
    %c0_i32 = arith.constant 0 : i32
    %c0_i32_0 = arith.constant 0 : i32
    %c0_i32_1 = arith.constant 0 : i32
    return %c0_i32, %c0_i32_0 : i32, i32
  }
  func.func @transform_9(%arg0: i32) -> (i32, i32) {
    %c0_i32 = arith.constant 0 : i32
    %c0_i32_0 = arith.constant 0 : i32
    %c0_i32_1 = arith.constant 0 : i32
    return %c0_i32, %c0_i32_0 : i32, i32
  }
  func.func @transform_10(%arg0: i32) -> (i32, i32) {
    %c0_i32 = arith.constant 0 : i32
    %c0_i32_0 = arith.constant 0 : i32
    %c0_i32_1 = arith.constant 0 : i32
    return %c0_i32, %c0_i32_0 : i32, i32
  }
  func.func @transform_11(%arg0: i32) -> (i32, i32) {
    %c0_i32 = arith.constant 0 : i32
    %c0_i32_0 = arith.constant 0 : i32
    return %c0_i32, %arg0 : i32, i32
  }
}

</mosaic_0001>

<bundles_post_ra>
// kernel: tile.8
= control target key start
LH: loop header
LB: loop body
LE: loop exit
PB: predicated region body
PF: predicated region fallthrough
CT: control target
= control target key end

     0   :  { %s34_s0 = inlined_call_operand.vmem [shape: f32[80], index: 0, kind: input, shape index: {}]   ;;  %s35_s1 = inlined_call_operand.vmem [shape: f32[18,80], index: 1, kind: output, shape index: {}]  }
   0x1   :  { %v4_v0 = vld [vmem:[%s34_s0] ss:$0 sm:$0xff] }
   0x2   :  { %5 = vst [vmem:[%s35_s1] sm:$0xff] %v4_v0  ;;  %10 = vst [vmem:[%s35_s1 + $0x8] sm:$0xff] %v4_v0 }
   0x3   :  { %11 = vst [vmem:[%s35_s1 + $0x10] sm:$0xff] %v4_v0 }

// kernel: tile.9
= control target key start
LH: loop header
LB: loop body
LE: loop exit
PB: predicated region body
PF: predicated region fallthrough
CT: control target
= control target key end

     0   :  { %s6_s6 = smov 3  ;;  %s9_s7 = smov 3  ;;  %vm11_vm0 = vcmask 130048   ;;  %vm31_vm1 = vcmask 392192   ;;  %vm27_vm2 = vcmask 261120   ;;  %vm15_vm3 = vcmask 523264   ;;  %s215_s0 = inlined_call_operand.vmem [shape: f32[18,80], index: 0, kind: input, shape index: {}]   ;;  %s216_s1 = inlined_call_operand.vmem [shape: f32[1440], index: 1, kind: output, shape index: {}]  }
   0x1   :  { %v90_v0 = vld [vmem:[%s215_s0 + $0x3] ss:$8 sm:%s6_s6]   ;;  %v98_v3 = vld [vmem:[%s215_s0 + $0x1] ss:$8 sm:$0x7]   ;;  %s118_s16 = smov 112  }
   0x2   :  { %v91_v1 = vld [vmem:[%s215_s0 + $0x3] ss:$8 sm:%s9_s7]   ;;  %v99_v4 = vld [vmem:[%s215_s0 + $0x1] ss:$8 sm:$0x7]   ;;  %s22_s17 = smov 3 }
   0x3   :  { %v12_v2 = vsel %vm11_vm0, %v91_v1, %v90_v0  ;;  %v42_v5 = vsel %vm31_vm1, %v99_v4, %v98_v3  ;;  %s25_s18 = smov 3  ;;  %s119_s19 = smov 80   ;;  %v94_v6 = vld [vmem:[%s215_s0 + $0x6] ss:$8 sm:%s22_s17]   ;;  %vm3_vm4 = vcmask 654336   ;;  %vm18_vm5 = vcmask 1048448  }
   0x4   :  { %13 = vrot.lane.b32.xlu0 %v12_v2, %s118_s16  ;;  %43 = vrot.lane.b32.xlu1 %v42_v5, %s119_s19  ;;  %s51_s22 = smov 3  ;;  %v95_v7 = vld [vmem:[%s215_s0 + $0x6] ss:$8 sm:%s25_s18]   ;;  %s54_s27 = smov 3  ;;  %vm48_vm6 = vcmask 1048192   ;;  %vm34_vm7 = vcmask 1048320  }
   0x5   :  { %v101_v8 = vld [vmem:[%s215_s0 + $0x4] ss:$8 sm:%s51_s22]   ;;  %v28_v9 = vsel %vm27_vm2, %v95_v7, %v94_v6  ;;  %s67_s30 = smov 3  ;;  %s120_s2 = smov 96   ;;  %vm63_vm8 = vcmask 1048064   ;;  %vm71_vm9 = vcmask 1047936  }
   0x6   :  { %v102_v10 = vld [vmem:[%s215_s0 + $0x4] ss:$8 sm:%s54_s27]   ;;  %s75_s3 = smov 3  ;;  %s121_s4 = smov 64   ;;  %v105_v12 = vld [vmem:[%s215_s0 + $0x7] ss:$8 sm:%s67_s30]  }
   0x7   :  { %v57_v11 = vsel %vm15_vm3, %v102_v10, %v101_v8  ;;  %v107_v13 = vld [vmem:[%s215_s0 + $0x2] ss:$8 sm:%s75_s3]   ;;  %s83_s9 = smov 3  ;;  %v2_v14 = vld [vmem:[%s215_s0] ss:$8 sm:$0x7]  }
   0x8   :  { %29 = vrot.lane.b32.xlu0 %v28_v9, %s120_s2  ;;  %58 = vrot.lane.b32.xlu1 %v57_v11, %s121_s4  ;;  %4 = vst.msk [vmem:[%s216_s1] ss:$5 sm:$0x7] %vm3_vm4, %v2_v14   ;;  %s122_s14 = smov 48   ;;  %s123_s15 = smov 32   ;;  %vm79_vm10 = vcmask 916736  }
   0x9   :  { %v109_v15 = vld [vmem:[%s215_s0 + $0x5] ss:$8 sm:%s83_s9]   ;;  %s124_s0 = smov 16   ;;  %vm87_vm11 = vcmask 785536  }
   0xc   :  { %69 = vrot.lane.b32.xlu0 %v105_v12, %s122_s14  ;;  %77 = vrot.lane.b32.xlu1 %v107_v13, %s123_s15 }
  0x10   :  { %85 = vrot.lane.b32.xlu0 %v109_v15, %s124_s0 }
  0x76   :  { %v14_v16 = vpop.permute.xlu0 %13   ;;  %v44_v17 = vpop.permute.xlu1 %43  }
  0x77   :  { %92 = vst.msk [vmem:[%s216_s1 + $0x2] ss:$5 sm:$0x3] %vm15_vm3, %v14_v16  }
  0x78   :  { %93 = vst.msk [vmem:[%s216_s1 + $0x1] ss:$5 sm:$0x3] %vm18_vm5, %v14_v16  }
  0x79   :  { %100 = vst.msk [vmem:[%s216_s1 + $0x1] ss:$5 sm:$0x7] %vm27_vm2, %v44_v17  }
  0x7a   :  { %49 = vst.msk [vmem:[%s216_s1] ss:$5 sm:$0x7] %vm48_vm6, %v44_v17   ;;  %v30_v18 = vpop.permute.xlu0 %29   ;;  %v59_v19 = vpop.permute.xlu1 %58  }
  0x7b   :  { %96 = vst.msk [vmem:[%s216_s1 + $0x4] ss:$5 sm:$0x3] %vm31_vm1, %v30_v18  }
  0x7c   :  { %97 = vst.msk [vmem:[%s216_s1 + $0x3] ss:$5 sm:$0x3] %vm34_vm7, %v30_v18  }
  0x7d   :  { %103 = vst.msk [vmem:[%s216_s1 + $0x3] ss:$5 sm:$0x3] %vm11_vm0, %v59_v19  }
  0x7e   :  { %104 = vst.msk [vmem:[%s216_s1 + $0x2] ss:$5 sm:$0x3] %vm63_vm8, %v59_v19   ;;  %v70_v20 = vpop.permute.xlu0 %69   ;;  %v78_v21 = vpop.permute.xlu1 %77  }
  0x7f   :  { %106 = vst.msk [vmem:[%s216_s1 + $0x4] ss:$5 sm:$0x3] %vm71_vm9, %v70_v20  }
  0x80   :  { %108 = vst.msk [vmem:[%s216_s1 + $0x1] ss:$5 sm:$0x3] %vm79_vm10, %v78_v21  }
  0x82   :  { %v86_v22 = vpop.permute.xlu0 %85  }
  0x83   :  { %110 = vst.msk [vmem:[%s216_s1 + $0x3] ss:$5 sm:$0x3] %vm87_vm11, %v86_v22  }

// kernel: regression_forward.1
= control target key start
LH: loop header
LB: loop body
LE: loop exit
PB: predicated region body
PF: predicated region fallthrough
CT: control target
= control target key end

     0   :  { %v2414_v3 = vmov 0.0   ;;  %vm105_vm0 = vcmask 719872   ;;  %vm2416_vm1 = vmmov 0   ;;  %vm1324_vm2 = vcmask 654336   ;;  %s3598_s1 = inlined_call_operand.vmem [shape: f32[3,88,512], index: 1, kind: input, shape index: {}]   ;;  %s3599_s0 = inlined_call_operand.vmem [shape: f32[8,88], index: 0, kind: input, shape index: {}]   ;;  %s3600_s3 = inlined_call_operand.vmem [shape: f32[3,512,80], index: 3, kind: input, shape index: {}]   ;;  %s3601_s2 = inlined_call_operand.vmem [shape: f32[3,1,512], index: 2, kind: input, shape index: {}]   ;;  %s3602_s5 = inlined_call_operand.vmem [shape: f32[80,40], index: 5, kind: input, shape index: {}]   ;;  %s3603_s7 = inlined_call_operand.vmem [shape: f32[40,40], index: 7, kind: input, shape index: {}]   ;;  %s3604_s4 = inlined_call_operand.vmem [shape: f32[1,80], index: 4, kind: input, shape index: {}]   ;;  %s3605_s6 = inlined_call_operand.vmem [shape: f32[1,40], index: 6, kind: input, shape index: {}]   ;;  %s3606_s10 = inlined_call_operand.vmem [shape: f32[8,1], index: 10, kind: input, shape index: {}]   ;;  %s3607_s8 = inlined_call_operand.vmem [shape: f32[1,40], index: 8, kind: input, shape index: {}]   ;;  %s3608_s9 = inlined_call_operand.vmem [shape: f32[8,40], index: 9, kind: input, shape index: {}]   ;;  %s3609_s11 = inlined_call_operand.vmem [shape: f32[8,8], index: 11, kind: output, shape index: {}]  }
   0x1   :  { %v40_v0 = vld [vmem:[%s3598_s1 + $0x8] sm:$0xff]  ;;  %v42_v2 = vld [vmem:[%s3598_s1 + $0x18] sm:$0xff]  ;;  %173 = vmatprep.mubr.f32.mxu0 %v2414_v3  ;;  %244 = vmatprep.mubr.f32.mxu1 %v2414_v3  ;;  %v39_v6 = vld [vmem:[%s3598_s1] sm:$0xff]  ;;  %vm1411_vm3 = vcmask 326656   ;;  %vm1569_vm4 = vcmask 64512  }
   0x2   :  { %v44_v1 = vld [vmem:[%s3598_s1 + $0x28] sm:$0xff]  ;;  %v46_v5 = vld [vmem:[%s3598_s1 + $0x38] sm:$0xff]  ;;  %v43_v7 = vld [vmem:[%s3598_s1 + $0x20] sm:$0xff] }
   0x3   :  { %v2076_v4 = vpack.c.bf16 %v44_v1, %v40_v0  ;;  %v2096_v8 = vpack.c.bf16 %v46_v5, %v42_v2  ;;  %v2078_v9 = vpack.c.bf16 %v43_v7, %v39_v6  ;;  %v41_v10 = vld [vmem:[%s3598_s1 + $0x10] sm:$0xff]  ;;  %v48_v12 = vld [vmem:[%s3598_s1 + $0x48] sm:$0xff]  ;;  %v50_v15 = vld [vmem:[%s3598_s1 + $0x58] sm:$0xff] }
   0x4   :  { %v45_v11 = vld [vmem:[%s3598_s1 + $0x30] sm:$0xff]  ;;  %v52_v14 = vld [vmem:[%s3598_s1 + $0x68] sm:$0xff]  ;;  %v54_v16 = vld [vmem:[%s3598_s1 + $0x78] sm:$0xff] }
   0x5   :  { %2077 = vmatprep.subr.bf16.mxu0 %v2076_v4  ;;  %v2098_v13 = vpack.c.bf16 %v45_v11, %v41_v10  ;;  %2097 = vmatprep.subr.bf16.mxu1 %v2096_v8  ;;  %v2080_v17 = vpack.c.bf16 %v52_v14, %v48_v12  ;;  %v2100_v18 = vpack.c.bf16 %v54_v16, %v50_v15  ;;  %v47_v19 = vld [vmem:[%s3598_s1 + $0x40] sm:$0xff]  ;;  %v49_v21 = vld [vmem:[%s3598_s1 + $0x50] sm:$0xff]  ;;  %v56_v24 = vld [vmem:[%s3598_s1 + $0x88] sm:$0xff] }
   0x6   :  { %2079 = vmatpush1.bf16.msra.mxu0 %v2078_v9  ;;  %v51_v20 = vld [vmem:[%s3598_s1 + $0x60] sm:$0xff]  ;;  %v53_v23 = vld [vmem:[%s3598_s1 + $0x70] sm:$0xff]  ;;  %v60_v25 = vld [vmem:[%s3598_s1 + $0xa8] sm:$0xff] }
   0x7   :  { %2099 = vmatpush1.bf16.msra.mxu1 %v2098_v13  ;;  %v2082_v22 = vpack.c.bf16 %v51_v20, %v47_v19  ;;  %2081 = vmatprep.subr.bf16.mxu0 %v2080_v17  ;;  %v2102_v26 = vpack.c.bf16 %v53_v23, %v49_v21  ;;  %v2084_v27 = vpack.c.bf16 %v60_v25, %v56_v24  ;;  %v58_v28 = vld [vmem:[%s3598_s1 + $0x98] sm:$0xff]  ;;  %v55_v30 = vld [vmem:[%s3598_s1 + $0x80] sm:$0xff]  ;;  %v57_v33 = vld [vmem:[%s3598_s1 + $0x90] sm:$0xff] }
   0x8   :  { %2101 = vmatprep.subr.bf16.mxu1 %v2100_v18  ;;  %v62_v29 = vld [vmem:[%s3598_s1 + $0xb8] sm:$0xff]  ;;  %v59_v32 = vld [vmem:[%s3598_s1 + $0xa0] sm:$0xff]  ;;  %v61_v34 = vld [vmem:[%s3598_s1 + $0xb0] sm:$0xff] }
   0x9   :  { %v2104_v31 = vpack.c.bf16 %v62_v29, %v58_v28  ;;  %v2086_v35 = vpack.c.bf16 %v59_v32, %v55_v30  ;;  %v64_v36 = vld [vmem:[%s3598_s1 + $0xc8] sm:$0xff]  ;;  %v66_v38 = vld [vmem:[%s3598_s1 + $0xd8] sm:$0xff]  ;;  %v2106_v39 = vpack.c.bf16 %v61_v34, %v57_v33  ;;  %v63_v42 = vld [vmem:[%s3598_s1 + $0xc0] sm:$0xff] }
   0xa   :  { %2083 = vmatpush1.bf16.msra.mxu0 %v2082_v22  ;;  %v68_v37 = vld [vmem:[%s3598_s1 + $0xe8] sm:$0xff]  ;;  %v70_v41 = vld [vmem:[%s3598_s1 + $0xf8] sm:$0xff]  ;;  %v67_v43 = vld [vmem:[%s3598_s1 + $0xe0] sm:$0xff] }
   0xb   :  { %2103 = vmatpush1.bf16.msra.mxu1 %v2102_v26  ;;  %2085 = vmatprep.subr.bf16.mxu0 %v2084_v27  ;;  %v2088_v40 = vpack.c.bf16 %v68_v37, %v64_v36  ;;  %v2108_v44 = vpack.c.bf16 %v70_v41, %v66_v38  ;;  %v65_v45 = vld [vmem:[%s3598_s1 + $0xd0] sm:$0xff]  ;;  %v72_v47 = vld [vmem:[%s3598_s1 + $0x108] sm:$0xff]  ;;  %v74_v49 = vld [vmem:[%s3598_s1 + $0x118] sm:$0xff]  ;;  %v2090_v51 = vpack.c.bf16 %v67_v43, %v63_v42 }
   0xc   :  { %2105 = vmatprep.subr.bf16.mxu1 %v2104_v31  ;;  %v69_v46 = vld [vmem:[%s3598_s1 + $0xf0] sm:$0xff]  ;;  %v76_v48 = vld [vmem:[%s3598_s1 + $0x128] sm:$0xff]  ;;  %v78_v50 = vld [vmem:[%s3598_s1 + $0x138] sm:$0xff] }
   0xd   :  { %v2110_v52 = vpack.c.bf16 %v69_v46, %v65_v45  ;;  %v2092_v53 = vpack.c.bf16 %v76_v48, %v72_v47  ;;  %v71_v54 = vld [vmem:[%s3598_s1 + $0x100] sm:$0xff]  ;;  %v2112_v56 = vpack.c.bf16 %v78_v50, %v74_v49  ;;  %v73_v57 = vld [vmem:[%s3598_s1 + $0x110] sm:$0xff]  ;;  %v80_v61 = vld [vmem:[%s3598_s1 + $0x148] sm:$0xff] }
   0xe   :  { %2087 = vmatpush1.bf16.msra.mxu0 %v2086_v35  ;;  %v75_v55 = vld [vmem:[%s3598_s1 + $0x120] sm:$0xff]  ;;  %v77_v58 = vld [vmem:[%s3598_s1 + $0x130] sm:$0xff]  ;;  %v82_v62 = vld [vmem:[%s3598_s1 + $0x158] sm:$0xff] }
   0xf   :  { %2107 = vmatpush1.bf16.msra.mxu1 %v2106_v39  ;;  %2089 = vmatprep.subr.bf16.mxu0 %v2088_v40  ;;  %v2094_v59 = vpack.c.bf16 %v75_v55, %v71_v54  ;;  %v2114_v60 = vpack.c.bf16 %v77_v58, %v73_v57  ;;  %v1578_v63 = vld [vmem:[%s3598_s1 + $0x168] sm:$0xff]  ;;  %v79_v0 = vld [vmem:[%s3598_s1 + $0x140] sm:$0xff]  ;;  %v1580_v2 = vld [vmem:[%s3598_s1 + $0x178] sm:$0xff] }
  0x10   :  { %2109 = vmatprep.subr.bf16.mxu1 %v2108_v44  ;;  %v1582_v1 = vld [vmem:[%s3598_s1 + $0x188] sm:$0xff]  ;;  %v1584_v4 = vld [vmem:[%s3598_s1 + $0x198] sm:$0xff]  ;;  %v81_v5 = vld [vmem:[%s3598_s1 + $0x150] sm:$0xff] }
  0x11   :  { %v1577_v6 = vld [vmem:[%s3598_s1 + $0x160] sm:$0xff]  ;;  %v1579_v8 = vld [vmem:[%s3598_s1 + $0x170] sm:$0xff]  ;;  %v1586_v10 = vld [vmem:[%s3598_s1 + $0x1a8] sm:$0xff]  ;;  %v2116_v13 = vpack.c.bf16 %v1582_v1, %v1578_v63  ;;  %v2136_v16 = vpack.c.bf16 %v1584_v4, %v1580_v2 }
  0x12   :  { %2091 = vmatpush1.bf16.msra.mxu0 %v2090_v51  ;;  %v1581_v7 = vld [vmem:[%s3598_s1 + $0x180] sm:$0xff]  ;;  %v1583_v9 = vld [vmem:[%s3598_s1 + $0x190] sm:$0xff]  ;;  %v1590_v11 = vld [vmem:[%s3598_s1 + $0x1c8] sm:$0xff] }
  0x13   :  { %2111 = vmatpush1.bf16.msra.mxu1 %v2110_v52  ;;  %2093 = vmatprep.subr.bf16.mxu0 %v2092_v53  ;;  %v2645_v12 = vld [vmem:[%s3599_s0] sm:$0xff]  ;;  %v1588_v14 = vld [vmem:[%s3598_s1 + $0x1b8] sm:$0xff]  ;;  %v2118_v17 = vpack.c.bf16 %v1581_v7, %v1577_v6  ;;  %v2138_v18 = vpack.c.bf16 %v1583_v9, %v1579_v8  ;;  %v2120_v19 = vpack.c.bf16 %v1590_v11, %v1586_v10  ;;  %v1587_v22 = vld [vmem:[%s3598_s1 + $0x1b0] sm:$0xff] }
  0x14   :  { %2113 = vmatprep.subr.bf16.mxu1 %v2112_v56  ;;  %v1592_v15 = vld [vmem:[%s3598_s1 + $0x1d8] sm:$0xff]  ;;  %v1585_v20 = vld [vmem:[%s3598_s1 + $0x1a0] sm:$0xff]  ;;  %v1591_v24 = vld [vmem:[%s3598_s1 + $0x1d0] sm:$0xff] }
  0x15   :  { %v1589_v21 = vld [vmem:[%s3598_s1 + $0x1c0] sm:$0xff]  ;;  %v2140_v23 = vpack.c.bf16 %v1592_v15, %v1588_v14  ;;  %v1594_v25 = vld [vmem:[%s3598_s1 + $0x1e8] sm:$0xff]  ;;  %v1596_v27 = vld [vmem:[%s3598_s1 + $0x1f8] sm:$0xff]  ;;  %v2142_v30 = vpack.c.bf16 %v1591_v24, %v1587_v22 }
  0x16   :  { %2095 = vmatpush1.bf16.msra.mxu0 %v2094_v59  ;;  %v1598_v26 = vld [vmem:[%s3598_s1 + $0x208] sm:$0xff]  ;;  %v1600_v28 = vld [vmem:[%s3598_s1 + $0x218] sm:$0xff]  ;;  %v2122_v29 = vpack.c.bf16 %v1589_v21, %v1585_v20  ;;  %v1593_v32 = vld [vmem:[%s3598_s1 + $0x1e0] sm:$0xff] }
  0x17   :  { %2115 = vmatpush1.bf16.msra.mxu1 %v2114_v60  ;;  %129 = vmatprep.subr.mxu0 %v80_v61  ;;  %v2124_v31 = vpack.c.bf16 %v1598_v26, %v1594_v25  ;;  %v1597_v33 = vld [vmem:[%s3598_s1 + $0x200] sm:$0xff]  ;;  %v1595_v34 = vld [vmem:[%s3598_s1 + $0x1f0] sm:$0xff]  ;;  %v2144_v35 = vpack.c.bf16 %v1600_v28, %v1596_v27  ;;  %v1602_v37 = vld [vmem:[%s3598_s1 + $0x228] sm:$0xff] }
  0x18   :  { %200 = vmatprep.subr.mxu1 %v82_v62  ;;  %v1599_v36 = vld [vmem:[%s3598_s1 + $0x210] sm:$0xff]  ;;  %v1606_v38 = vld [vmem:[%s3598_s1 + $0x248] sm:$0xff]  ;;  %v1604_v39 = vld [vmem:[%s3598_s1 + $0x238] sm:$0xff]  ;;  %v2126_v41 = vpack.c.bf16 %v1597_v33, %v1593_v32 }
  0x19   :  { %v1608_v40 = vld [vmem:[%s3598_s1 + $0x258] sm:$0xff]  ;;  %v2146_v42 = vpack.c.bf16 %v1599_v36, %v1595_v34  ;;  %v2128_v43 = vpack.c.bf16 %v1606_v38, %v1602_v37  ;;  %v1601_v44 = vld [vmem:[%s3598_s1 + $0x220] sm:$0xff]  ;;  %v1603_v46 = vld [vmem:[%s3598_s1 + $0x230] sm:$0xff] }
  0x1a   :  { %130 = vmatpush1.msra.mxu0 %v79_v0  ;;  %v1605_v45 = vld [vmem:[%s3598_s1 + $0x240] sm:$0xff]  ;;  %v2148_v47 = vpack.c.bf16 %v1608_v40, %v1604_v39  ;;  %v1607_v48 = vld [vmem:[%s3598_s1 + $0x250] sm:$0xff]  ;;  %v1610_v49 = vld [vmem:[%s3598_s1 + $0x268] sm:$0xff] }
  0x1b   :  { %201 = vmatpush1.msra.mxu1 %v81_v5  ;;  %1575 = vmatmul.mubr.msk.f32.vlgmr.msra.gmra.mrb[0].mxu0 %vm105_vm0, %v2645_v12  ;;  %v1614_v50 = vld [vmem:[%s3598_s1 + $0x288] sm:$0xff]  ;;  %v1612_v51 = vld [vmem:[%s3598_s1 + $0x278] sm:$0xff]  ;;  %v2130_v53 = vpack.c.bf16 %v1605_v45, %v1601_v44  ;;  %v2150_v54 = vpack.c.bf16 %v1607_v48, %v1603_v46  ;;  %v1609_v56 = vld [vmem:[%s3598_s1 + $0x260] sm:$0xff] }
  0x1c   :  { %1576 = vmatmul.mubr.msk.f32.vlgmr.msra.gmra.mrb[0].mxu1 %vm105_vm0, %v2645_v12  ;;  %2117 = vmatprep.subr.bf16.mxu0 %v2116_v13  ;;  %v1616_v52 = vld [vmem:[%s3598_s1 + $0x298] sm:$0xff]  ;;  %v2132_v55 = vpack.c.bf16 %v1614_v50, %v1610_v49  ;;  %v1613_v57 = vld [vmem:[%s3598_s1 + $0x280] sm:$0xff]  ;;  %v1611_v59 = vld [vmem:[%s3598_s1 + $0x270] sm:$0xff] }
  0x1d   :  { %2137 = vmatprep.subr.bf16.mxu1 %v2136_v16  ;;  %2119 = vmatpush1.bf16.msra.mxu0 %v2118_v17  ;;  %v2152_v58 = vpack.c.bf16 %v1616_v52, %v1612_v51  ;;  %v1615_v60 = vld [vmem:[%s3598_s1 + $0x290] sm:$0xff]  ;;  %v2134_v61 = vpack.c.bf16 %v1613_v57, %v1609_v56  ;;  %v1618_v63 = vld [vmem:[%s3598_s1 + $0x2a8] sm:$0xff]  ;;  %v1620_v0 = vld [vmem:[%s3598_s1 + $0x2b8] sm:$0xff] }
  0x1e   :  { %2139 = vmatpush1.bf16.msra.mxu1 %v2138_v18  ;;  %2121 = vmatprep.subr.bf16.mxu0 %v2120_v19  ;;  %v2154_v62 = vpack.c.bf16 %v1615_v60, %v1611_v59  ;;  %v1640_v1 = vld [vmem:[%s3600_s3 + $0x280] sm:$0xff]  ;;  %v1641_v2 = vld [vmem:[%s3600_s3 + $0x288] sm:$0xff]  ;;  %v1619_v11 = vld [vmem:[%s3598_s1 + $0x2b0] sm:$0xff] }
  0x1f   :  { %2141 = vmatprep.subr.bf16.mxu1 %v2140_v23  ;;  %451 = vmatprep.mubr.f32.mxu0 %v2414_v3  ;;  %v1672_v4 = vld [vmem:[%s3600_s3 + $0x380] sm:$0xff]  ;;  %v1673_v5 = vld [vmem:[%s3600_s3 + $0x388] sm:$0xff]  ;;  %v2156_v13 = vpack.c.bf16 %v1641_v2, %v1640_v1  ;;  %v1642_v17 = vld [vmem:[%s3600_s3 + $0x290] sm:$0xff] }
  0x20   :  { %522 = vmatprep.mubr.f32.mxu1 %v2414_v3  ;;  %v1624_v6 = vld [vmem:[%s3600_s3 + $0x200] sm:$0xff]  ;;  %v1625_v7 = vld [vmem:[%s3600_s3 + $0x208] sm:$0xff]  ;;  %v2188_v14 = vpack.c.bf16 %v1673_v5, %v1672_v4  ;;  %v1643_v18 = vld [vmem:[%s3600_s3 + $0x298] sm:$0xff] }
  0x21   :  { %2123 = vmatpush1.bf16.msra.mxu0 %v2122_v29  ;;  %v1617_v8 = vld [vmem:[%s3598_s1 + $0x2a0] sm:$0xff]  ;;  %v1657_v10 = vld [vmem:[%s3600_s3 + $0x308] sm:$0xff]  ;;  %v2158_v15 = vpack.c.bf16 %v1625_v7, %v1624_v6  ;;  %v1674_v19 = vld [vmem:[%s3600_s3 + $0x390] sm:$0xff]  ;;  %v2160_v20 = vpack.c.bf16 %v1643_v18, %v1642_v17 }
  0x22   :  { %2143 = vmatpush1.bf16.msra.mxu1 %v2142_v30  ;;  %2125 = vmatprep.subr.bf16.mxu0 %v2124_v31  ;;  %v1656_v9 = vld [vmem:[%s3600_s3 + $0x300] sm:$0xff]  ;;  %v1675_v21 = vld [vmem:[%s3600_s3 + $0x398] sm:$0xff]  ;;  %v1626_v22 = vld [vmem:[%s3600_s3 + $0x210] sm:$0xff] }
  0x23   :  { %2145 = vmatprep.subr.bf16.mxu1 %v2144_v35  ;;  %v2190_v16 = vpack.c.bf16 %v1657_v10, %v1656_v9  ;;  %v1627_v23 = vld [vmem:[%s3600_s3 + $0x218] sm:$0xff]  ;;  %v2192_v24 = vpack.c.bf16 %v1675_v21, %v1674_v19  ;;  %v1658_v26 = vld [vmem:[%s3600_s3 + $0x310] sm:$0xff]  ;;  %v1644_v29 = vld [vmem:[%s3600_s3 + $0x2a0] sm:$0xff] }
  0x24   :  { %v2162_v25 = vpack.c.bf16 %v1627_v23, %v1626_v22  ;;  %v1659_v27 = vld [vmem:[%s3600_s3 + $0x318] sm:$0xff]  ;;  %v1645_v30 = vld [vmem:[%s3600_s3 + $0x2a8] sm:$0xff]  ;;  %v1676_v31 = vld [vmem:[%s3600_s3 + $0x3a0] sm:$0xff] }
  0x25   :  { %2127 = vmatpush1.bf16.msra.mxu0 %v2126_v41  ;;  %v2194_v28 = vpack.c.bf16 %v1659_v27, %v1658_v26  ;;  %v2164_v32 = vpack.c.bf16 %v1645_v30, %v1644_v29  ;;  %v1677_v33 = vld [vmem:[%s3600_s3 + $0x3a8] sm:$0xff]  ;;  %v1628_v34 = vld [vmem:[%s3600_s3 + $0x220] sm:$0xff]  ;;  %v1646_v40 = vld [vmem:[%s3600_s3 + $0x2b0] sm:$0xff] }
  0x26   :  { %2147 = vmatpush1.bf16.msra.mxu1 %v2146_v42  ;;  %2129 = vmatprep.subr.bf16.mxu0 %v2128_v43  ;;  %v1629_v35 = vld [vmem:[%s3600_s3 + $0x228] sm:$0xff]  ;;  %v2196_v36 = vpack.c.bf16 %v1677_v33, %v1676_v31  ;;  %v1660_v38 = vld [vmem:[%s3600_s3 + $0x320] sm:$0xff]  ;;  %v1647_v42 = vld [vmem:[%s3600_s3 + $0x2b8] sm:$0xff] }
  0x27   :  { %2149 = vmatprep.subr.bf16.mxu1 %v2148_v47  ;;  %v2166_v37 = vpack.c.bf16 %v1629_v35, %v1628_v34  ;;  %v1661_v39 = vld [vmem:[%s3600_s3 + $0x328] sm:$0xff]  ;;  %v1678_v43 = vld [vmem:[%s3600_s3 + $0x3b0] sm:$0xff]  ;;  %v1679_v44 = vld [vmem:[%s3600_s3 + $0x3b8] sm:$0xff]  ;;  %v2168_v45 = vpack.c.bf16 %v1647_v42, %v1646_v40 }
  0x28   :  { %v2198_v41 = vpack.c.bf16 %v1661_v39, %v1660_v38  ;;  %v2200_v46 = vpack.c.bf16 %v1679_v44, %v1678_v43  ;;  %v1630_v47 = vld [vmem:[%s3600_s3 + $0x230] sm:$0xff]  ;;  %v1631_v48 = vld [vmem:[%s3600_s3 + $0x238] sm:$0xff]  ;;  %v1648_v52 = vld [vmem:[%s3600_s3 + $0x2c0] sm:$0xff] }
  0x29   :  { %2131 = vmatpush1.bf16.msra.mxu0 %v2130_v53  ;;  %v1662_v49 = vld [vmem:[%s3600_s3 + $0x330] sm:$0xff]  ;;  %v2170_v50 = vpack.c.bf16 %v1631_v48, %v1630_v47  ;;  %v1663_v51 = vld [vmem:[%s3600_s3 + $0x338] sm:$0xff]  ;;  %v1649_v53 = vld [vmem:[%s3600_s3 + $0x2c8] sm:$0xff] }
  0x2a   :  { %2151 = vmatpush1.bf16.msra.mxu1 %v2150_v54  ;;  %2133 = vmatprep.subr.bf16.mxu0 %v2132_v55  ;;  %v2202_v54 = vpack.c.bf16 %v1663_v51, %v1662_v49  ;;  %v2172_v55 = vpack.c.bf16 %v1649_v53, %v1648_v52  ;;  %v1680_v56 = vld [vmem:[%s3600_s3 + $0x3c0] sm:$0xff]  ;;  %v1681_v57 = vld [vmem:[%s3600_s3 + $0x3c8] sm:$0xff]  ;;  %v1651_v1 = vld [vmem:[%s3600_s3 + $0x2d8] sm:$0xff]  ;;  %v85_v49 = vlaneseq }
  0x2b   :  { %2153 = vmatprep.subr.bf16.mxu1 %v2152_v58  ;;  %v1632_v58 = vld [vmem:[%s3600_s3 + $0x240] sm:$0xff]  ;;  %v2204_v59 = vpack.c.bf16 %v1681_v57, %v1680_v56  ;;  %v1633_v60 = vld [vmem:[%s3600_s3 + $0x248] sm:$0xff]  ;;  %v1682_v2 = vld [vmem:[%s3600_s3 + $0x3d0] sm:$0xff] }
  0x2c   :  { %v1683_v6 = vld [vmem:[%s3600_s3 + $0x3d8] sm:$0xff]  ;;  %v1634_v7 = vld [vmem:[%s3600_s3 + $0x250] sm:$0xff]  ;;  %v1637_v21 = vld [vmem:[%s3600_s3 + $0x268] sm:$0xff] }
  0x2d   :  { %2135 = vmatpush1.bf16.msra.mxu0 %v2134_v61  ;;  %v1664_v61 = vld [vmem:[%s3600_s3 + $0x340] sm:$0xff]  ;;  %v2208_v9 = vpack.c.bf16 %v1683_v6, %v1682_v2  ;;  %v1666_v10 = vld [vmem:[%s3600_s3 + $0x350] sm:$0xff]  ;;  %v1687_v31 = vld [vmem:[%s3600_s3 + $0x3f8] sm:$0xff] }
  0x2e   :  { %2155 = vmatpush1.bf16.msra.mxu1 %v2154_v62  ;;  %407 = vmatprep.subr.mxu0 %v1618_v63  ;;  %v1665_v62 = vld [vmem:[%s3600_s3 + $0x348] sm:$0xff]  ;;  %v2174_v63 = vpack.c.bf16 %v1633_v60, %v1632_v58  ;;  %v1668_v23 = vld [vmem:[%s3600_s3 + $0x360] sm:$0xff]  ;;  %v1654_v27 = vld [vmem:[%s3600_s3 + $0x2f0] sm:$0xff] }
  0x2f   :  { %478 = vmatprep.subr.mxu1 %v1620_v0  ;;  %v1650_v0 = vld [vmem:[%s3600_s3 + $0x2d0] sm:$0xff]  ;;  %v2206_v4 = vpack.c.bf16 %v1665_v62, %v1664_v61  ;;  %v1639_v33 = vld [vmem:[%s3600_s3 + $0x278] sm:$0xff]  ;;  %v271_v39 = vld [vmem:[%s3600_s3 + $0x80] sm:$0xff] }
  0x30   :  { %v2176_v5 = vpack.c.bf16 %v1651_v1, %v1650_v0  ;;  %v1686_v29 = vld [vmem:[%s3600_s3 + $0x3f0] sm:$0xff]  ;;  %v272_v40 = vld [vmem:[%s3600_s3 + $0x88] sm:$0xff]  ;;  %v1621_v51 = vld [vmem:[%s3601_s2 + $0x4] sm:$0xf] }
  0x31   :  { %408 = vmatpush1.msra.mxu0 %v1617_v8  ;;  %v1635_v8 = vld [vmem:[%s3600_s3 + $0x258] sm:$0xff]  ;;  %v2216_v34 = vpack.c.bf16 %v1687_v31, %v1686_v29  ;;  %v2220_v42 = vpack.c.bf16 %v272_v40, %v271_v39  ;;  %v304_v43 = vld [vmem:[%s3600_s3 + $0x188] sm:$0xff]  ;;  %v259_v40 = vld [vmem:[%s3600_s3 + $0x20] sm:$0xff] }
  0x32   :  { %479 = vmatpush1.msra.mxu1 %v1619_v11  ;;  %1622 = vmatmul.mubr.msk.f32.vlgmr.msra.gmra.mrb[2].mxu0 %vm105_vm0, %v2645_v12  ;;  %v1667_v11 = vld [vmem:[%s3600_s3 + $0x358] sm:$0xff]  ;;  %v2178_v17 = vpack.c.bf16 %v1635_v8, %v1634_v7  ;;  %v276_v31 = vld [vmem:[%s3600_s3 + $0xa8] sm:$0xff] }
  0x33   :  { %1623 = vmatmul.mubr.msk.f32.vlgmr.msra.gmra.mrb[2].mxu1 %vm105_vm0, %v2645_v12  ;;  %2157 = vmatprep.subr.bf16.mxu0 %v2156_v13  ;;  %v1652_v13 = vld [vmem:[%s3600_s3 + $0x2e0] sm:$0xff]  ;;  %v2210_v18 = vpack.c.bf16 %v1667_v11, %v1666_v10  ;;  %v288_v10 = vld [vmem:[%s3600_s3 + $0x108] sm:$0xff]  ;;  %v290_v29 = vld [vmem:[%s3600_s3 + $0x118] sm:$0xff] }
  0x34   :  { %2189 = vmatprep.subr.bf16.mxu1 %v2188_v14  ;;  %2159 = vmatpush3.bf16.msra.mxu0 %v2158_v15  ;;  %v1653_v14 = vld [vmem:[%s3600_s3 + $0x2e8] sm:$0xff]  ;;  %v1684_v15 = vld [vmem:[%s3600_s3 + $0x3e0] sm:$0xff] }
  0x35   :  { %2191 = vmatpush3.bf16.msra.mxu1 %v2190_v16  ;;  %2161 = vmatprep.subr.bf16.mxu0 %v2160_v20  ;;  %v1685_v16 = vld [vmem:[%s3600_s3 + $0x3e8] sm:$0xff]  ;;  %v2180_v19 = vpack.c.bf16 %v1653_v14, %v1652_v13  ;;  %v1636_v20 = vld [vmem:[%s3600_s3 + $0x260] sm:$0xff]  ;;  %v273_v14 = vld [vmem:[%s3600_s3 + $0x90] sm:$0xff] }
  0x36   :  { %2193 = vmatprep.subr.bf16.mxu1 %v2192_v24  ;;  %v2212_v22 = vpack.c.bf16 %v1685_v16, %v1684_v15  ;;  %v1669_v24 = vld [vmem:[%s3600_s3 + $0x368] sm:$0xff]  ;;  %v274_v15 = vld [vmem:[%s3600_s3 + $0x98] sm:$0xff] }
  0x37   :  { %v2214_v26 = vpack.c.bf16 %v1669_v24, %v1668_v23  ;;  %v257_v24 = vld [vmem:[%s3600_s3 + $0x10] sm:$0xff] }
  0x38   :  { %2163 = vmatpush3.bf16.msra.mxu0 %v2162_v25  ;;  %v2182_v25 = vpack.c.bf16 %v1637_v21, %v1636_v20  ;;  %v306_v20 = vld [vmem:[%s3600_s3 + $0x198] sm:$0xff] }
  0x39   :  { %2195 = vmatpush3.bf16.msra.mxu1 %v2194_v28  ;;  %2165 = vmatprep.subr.bf16.mxu0 %v2164_v32  ;;  %v1655_v28 = vld [vmem:[%s3600_s3 + $0x2f8] sm:$0xff]  ;;  %v1638_v32 = vld [vmem:[%s3600_s3 + $0x270] sm:$0xff] }
  0x3a   :  { %2197 = vmatprep.subr.bf16.mxu1 %v2196_v36  ;;  %v2184_v30 = vpack.c.bf16 %v1655_v28, %v1654_v27  ;;  %v2186_v35 = vpack.c.bf16 %v1639_v33, %v1638_v32  ;;  %v1670_v36 = vld [vmem:[%s3600_s3 + $0x370] sm:$0xff]  ;;  %v2224_v28 = vpack.c.bf16 %v274_v15, %v273_v14  ;;  %v282_v15 = vld [vmem:[%s3600_s3 + $0xd8] sm:$0xff] }
  0x3b   :  { %v281_v14 = vld [vmem:[%s3600_s3 + $0xd0] sm:$0xff] }
  0x3c   :  { %2167 = vmatpush3.bf16.msra.mxu0 %v2166_v37  ;;  %v1671_v37 = vld [vmem:[%s3600_s3 + $0x378] sm:$0xff] }
  0x3d   :  { %2199 = vmatpush3.bf16.msra.mxu1 %v2198_v41  ;;  %2169 = vmatprep.subr.bf16.mxu0 %v2168_v45  ;;  %v2218_v38 = vpack.c.bf16 %v1671_v37, %v1670_v36  ;;  %v303_v41 = vld [vmem:[%s3600_s3 + $0x180] sm:$0xff] }
  0x3e   :  { %2201 = vmatprep.subr.bf16.mxu1 %v2200_v46  ;;  %v2252_v44 = vpack.c.bf16 %v304_v43, %v303_v41  ;;  %v260_v41 = vld [vmem:[%s3600_s3 + $0x28] sm:$0xff] }
  0x40   :  { %2171 = vmatpush3.bf16.msra.mxu0 %v2170_v50  ;;  %v86_v50 = vshrl.u32 %v85_v49, 7  ;;  %v309_v49 = vld [vmem:[%s3600_s3 + $0x1b0] sm:$0xff] }
  0x41   :  { %2203 = vmatpush3.bf16.msra.mxu1 %v2202_v54  ;;  %2173 = vmatprep.subr.bf16.mxu0 %v2172_v55  ;;  %v2977_v54 = vld [vmem:[%s3601_s2] sm:$0xf] }
  0x42   :  { %2205 = vmatprep.subr.bf16.mxu1 %v2204_v59  ;;  %v2970_v52 = vsub.s32 0, %v86_v50  ;;  %v2972_v53 = vsub.s32 1, %v86_v50  ;;  %v2979_v55 = vsub.s32 2, %v86_v50  ;;  %v2981_v56 = vsub.s32 3, %v86_v50  ;;  %v310_v50 = vld [vmem:[%s3600_s3 + $0x1b8] sm:$0xff] }
  0x44   :  { %2175 = vmatpush3.bf16.msra.mxu0 %v2174_v63  ;;  %v370_v57 = vrot.slane %v1621_v51, %v2970_v52  ;;  %v378_v58 = vrot.slane %v1621_v51, %v2979_v55  ;;  %v374_v59 = vrot.slane %v1621_v51, %v2972_v53  ;;  %v92_v60 = vrot.slane %v2977_v54, %v2972_v53 }
  0x45   :  { %2207 = vmatpush3.bf16.msra.mxu1 %v2206_v4  ;;  %2177 = vmatprep.subr.bf16.mxu0 %v2176_v5  ;;  %v382_v61 = vrot.slane %v1621_v51, %v2981_v56  ;;  %v100_v62 = vrot.slane %v2977_v54, %v2981_v56  ;;  %v255_v4 = vld [vmem:[%s3600_s3] sm:$0xff]  ;;  %v256_v5 = vld [vmem:[%s3600_s3 + $0x8] sm:$0xff]  ;;  %v2230_v51 = vpack.c.bf16 %v260_v41, %v259_v40  ;;  %v317_v40 = vld [vmem:[%s3600_s3 + $0x1f0] sm:$0xff] }
  0x46   :  { %2209 = vmatprep.subr.bf16.mxu1 %v2208_v9  ;;  %v287_v9 = vld [vmem:[%s3600_s3 + $0x100] sm:$0xff]  ;;  %v318_v41 = vld [vmem:[%s3600_s3 + $0x1f8] sm:$0xff] }
  0x47   :  { %v2254_v23 = vpack.c.bf16 %v288_v10, %v287_v9  ;;  %v264_v9 = vld [vmem:[%s3600_s3 + $0x48] sm:$0xff]  ;;  %v295_v10 = vld [vmem:[%s3600_s3 + $0x140] sm:$0xff] }
  0x48   :  { %2179 = vmatpush3.bf16.msra.mxu0 %v2178_v17 }
  0x49   :  { %2211 = vmatpush3.bf16.msra.mxu1 %v2210_v18  ;;  %2181 = vmatprep.subr.bf16.mxu0 %v2180_v19  ;;  %v2222_v18 = vpack.c.bf16 %v256_v5, %v255_v4  ;;  %v305_v19 = vld [vmem:[%s3600_s3 + $0x190] sm:$0xff]  ;;  %v312_v4 = vld [vmem:[%s3600_s3 + $0x1c8] sm:$0xff] }
  0x4a   :  { %2213 = vmatprep.subr.bf16.mxu1 %v2212_v22  ;;  %v2256_v33 = vpack.c.bf16 %v306_v20, %v305_v19  ;;  %v2240_v20 = vpack.c.bf16 %v282_v15, %v281_v14 }
  0x4c   :  { %2183 = vmatpush3.bf16.msra.mxu0 %v2182_v25  ;;  %v258_v25 = vld [vmem:[%s3600_s3 + $0x18] sm:$0xff] }
  0x4d   :  { %2215 = vmatpush3.bf16.msra.mxu1 %v2214_v26  ;;  %2185 = vmatprep.subr.bf16.mxu0 %v2184_v30  ;;  %v289_v26 = vld [vmem:[%s3600_s3 + $0x110] sm:$0xff]  ;;  %v275_v30 = vld [vmem:[%s3600_s3 + $0xa0] sm:$0xff]  ;;  %v2226_v37 = vpack.c.bf16 %v258_v25, %v257_v24  ;;  %v298_v25 = vld [vmem:[%s3600_s3 + $0x158] sm:$0xff] }
  0x4e   :  { %2217 = vmatprep.subr.bf16.mxu1 %v2216_v34  ;;  %v307_v34 = vld [vmem:[%s3600_s3 + $0x1a0] sm:$0xff]  ;;  %v2228_v39 = vpack.c.bf16 %v276_v31, %v275_v30 }
  0x50   :  { %2187 = vmatpush3.bf16.msra.mxu0 %v2186_v35  ;;  %v308_v35 = vld [vmem:[%s3600_s3 + $0x1a8] sm:$0xff] }
  0x51   :  { %2219 = vmatpush3.bf16.msra.mxu1 %v2218_v38  ;;  %2221 = vmatprep.subr.bf16.mxu0 %v2220_v42  ;;  %v2258_v38 = vpack.c.bf16 %v290_v29, %v289_v26  ;;  %v291_v42 = vld [vmem:[%s3600_s3 + $0x120] sm:$0xff]  ;;  %v2260_v43 = vpack.c.bf16 %v308_v35, %v307_v34  ;;  %v316_v29 = vld [vmem:[%s3600_s3 + $0x1e8] sm:$0xff] }
  0x52   :  { %2253 = vmatprep.subr.bf16.mxu1 %v2252_v44  ;;  %v292_v44 = vld [vmem:[%s3600_s3 + $0x128] sm:$0xff]  ;;  %v283_v26 = vld [vmem:[%s3600_s3 + $0xe0] sm:$0xff] }
  0x53   :  { %v268_v34 = vld [vmem:[%s3600_s3 + $0x68] sm:$0xff]  ;;  %v299_v35 = vld [vmem:[%s3600_s3 + $0x160] sm:$0xff] }
  0xee   :  { %v2963_v45 = vpop.f32.mrb[0].mxu0 }
  0xef   :  { %v2965_v46 = vpop.f32.mrb[0].mxu1  ;;  %v177_v47 = vpop.f32.mrb[1].mxu0 }
  0xf0   :  { %v248_v48 = vpop.f32.mrb[1].mxu1  ;;  %v178_v11 = vadd.f32 %v177_v47, %v92_v60  ;;  %v277_v47 = vld [vmem:[%s3600_s3 + $0xb0] sm:$0xff]  ;;  %v262_v60 = vld [vmem:[%s3600_s3 + $0x38] sm:$0xff] }
  0xf1   :  { %v249_v16 = vadd.f32 %v248_v48, %v100_v62  ;;  %v278_v48 = vld [vmem:[%s3600_s3 + $0xb8] sm:$0xff]  ;;  %v2264_v62 = vpack.c.bf16 %v310_v50, %v309_v49  ;;  %v301_v50 = vld [vmem:[%s3600_s3 + $0x170] sm:$0xff] }
  0xf2   :  { %v252_v32 = vmax.f32 %v178_v11, 0.0  ;;  %v270_v49 = vld [vmem:[%s3600_s3 + $0x78] sm:$0xff] }
  0xf3   :  { %v254_v36 = vmax.f32 %v249_v16, 0.0  ;;  %v313_v16 = vld [vmem:[%s3600_s3 + $0x1d0] sm:$0xff] }
 0x105   :  { %v453_v63 = vpop.f32.mrb[2].mxu0 }
 0x106   :  { %v454_v0 = vadd.f32 %v453_v63, %v370_v57  ;;  %v524_v1 = vpop.f32.mrb[2].mxu1  ;;  %v455_v2 = vpop.f32.mrb[3].mxu0  ;;  %v2262_v57 = vpack.c.bf16 %v292_v44, %v291_v42  ;;  %v294_v63 = vld [vmem:[%s3600_s3 + $0x138] sm:$0xff] }
 0x107   :  { %v525_v6 = vadd.f32 %v524_v1, %v378_v58  ;;  %v456_v7 = vadd.f32 %v455_v2, %v374_v59  ;;  %v526_v8 = vpop.f32.mrb[3].mxu1  ;;  %v2232_v58 = vpack.c.bf16 %v278_v48, %v277_v47  ;;  %v261_v59 = vld [vmem:[%s3600_s3 + $0x30] sm:$0xff]  ;;  %v280_v1 = vld [vmem:[%s3600_s3 + $0xc8] sm:$0xff]  ;;  %v311_v2 = vld [vmem:[%s3600_s3 + $0x1c0] sm:$0xff] }
 0x108   :  { %v527_v13 = vadd.f32 %v526_v8, %v382_v61  ;;  %v529_v21 = vmax.f32 %v454_v0, 0.0  ;;  %v293_v61 = vld [vmem:[%s3600_s3 + $0x130] sm:$0xff]  ;;  %v279_v0 = vld [vmem:[%s3600_s3 + $0xc0] sm:$0xff]  ;;  %v2234_v5 = vpack.c.bf16 %v262_v60, %v261_v59  ;;  %v2268_v11 = vpack.c.bf16 %v312_v4, %v311_v2  ;;  %v1689_v59 = vld [vmem:[%s3598_s1 + $0x2c8] sm:$0xff] }
 0x109   :  { %v530_v17 = vmax.f32 %v456_v7, 0.0  ;;  %v531_v27 = vmax.f32 %v525_v6, 0.0  ;;  %v2266_v6 = vpack.c.bf16 %v294_v63, %v293_v61  ;;  %v2236_v7 = vpack.c.bf16 %v280_v1, %v279_v0  ;;  %v263_v8 = vld [vmem:[%s3600_s3 + $0x40] sm:$0xff]  ;;  %v269_v48 = vld [vmem:[%s3600_s3 + $0x70] sm:$0xff]  ;;  %v1693_v60 = vld [vmem:[%s3598_s1 + $0x2e8] sm:$0xff] }
 0x10a   :  { %v532_v22 = vmax.f32 %v527_v13, 0.0  ;;  %v296_v13 = vld [vmem:[%s3600_s3 + $0x148] sm:$0xff]  ;;  %v1691_v61 = vld [vmem:[%s3598_s1 + $0x2d8] sm:$0xff]  ;;  %v2284_v1 = vpack.c.bf16 %v1693_v60, %v1689_v59  ;;  %v1688_v2 = vld [vmem:[%s3598_s1 + $0x2c0] sm:$0xff] }
 0x10b   :  { %662 = vmatprep.mubr.f32.mxu0 %v530_v17  ;;  %v314_v17 = vld [vmem:[%s3600_s3 + $0x1d8] sm:$0xff]  ;;  %v2270_v19 = vpack.c.bf16 %v296_v13, %v295_v10  ;;  %v1692_v4 = vld [vmem:[%s3598_s1 + $0x2e0] sm:$0xff] }
 0x10c   :  { %732 = vmatprep.mubr.f32.mxu1 %v532_v22  ;;  %663 = vmatmul.mubr.f32.vlgmr.msra.gmra.mrb[4].mxu0 %v529_v21  ;;  %v265_v21 = vld [vmem:[%s3600_s3 + $0x50] sm:$0xff]  ;;  %v266_v22 = vld [vmem:[%s3600_s3 + $0x58] sm:$0xff]  ;;  %v2272_v24 = vpack.c.bf16 %v314_v17, %v313_v16  ;;  %v1696_v16 = vld [vmem:[%s3598_s1 + $0x300] sm:$0xff] }
 0x10d   :  { %733 = vmatmul.mubr.f32.vlgmr.msra.gmra.mrb[4].mxu1 %v531_v27  ;;  %2223 = vmatpush3.bf16.msra.mxu0 %v2222_v18  ;;  %v2238_v18 = vpack.c.bf16 %v264_v9, %v263_v8  ;;  %v284_v27 = vld [vmem:[%s3600_s3 + $0xe8] sm:$0xff]  ;;  %v2242_v30 = vpack.c.bf16 %v266_v22, %v265_v21  ;;  %v1699_v10 = vld [vmem:[%s3598_s1 + $0x318] sm:$0xff]  ;;  %v1700_v17 = vld [vmem:[%s3598_s1 + $0x320] sm:$0xff] }
 0x10e   :  { %2255 = vmatpush3.bf16.msra.mxu1 %v2254_v23  ;;  %802 = vmatprep.mubr.f32.mxu0 %v252_v32  ;;  %v297_v23 = vld [vmem:[%s3600_s3 + $0x150] sm:$0xff]  ;;  %v2244_v32 = vpack.c.bf16 %v284_v27, %v283_v26  ;;  %v1697_v8 = vld [vmem:[%s3598_s1 + $0x308] sm:$0xff]  ;;  %v2290_v26 = vpack.c.bf16 %v1700_v17, %v1696_v16  ;;  %v1720_v60 = vld [vmem:[%s3598_s1 + $0x3c0] sm:$0xff] }
 0x10f   :  { %872 = vmatprep.mubr.f32.mxu1 %v254_v36  ;;  %2225 = vmatprep.subr.bf16.mxu0 %v2224_v28  ;;  %v315_v28 = vld [vmem:[%s3600_s3 + $0x1e0] sm:$0xff]  ;;  %v2274_v31 = vpack.c.bf16 %v298_v25, %v297_v23  ;;  %v1701_v9 = vld [vmem:[%s3598_s1 + $0x328] sm:$0xff]  ;;  %v1702_v21 = vld [vmem:[%s3598_s1 + $0x330] sm:$0xff] }
 0x110   :  { %2257 = vmatprep.subr.bf16.mxu1 %v2256_v33  ;;  %v267_v33 = vld [vmem:[%s3600_s3 + $0x60] sm:$0xff]  ;;  %v2276_v36 = vpack.c.bf16 %v316_v29, %v315_v28  ;;  %v2288_v15 = vpack.c.bf16 %v1701_v9, %v1697_v8  ;;  %v1705_v22 = vld [vmem:[%s3598_s1 + $0x348] sm:$0xff]  ;;  %v1711_v25 = vld [vmem:[%s3598_s1 + $0x378] sm:$0xff] }
 0x111   :  { %2227 = vmatpush3.bf16.msra.mxu0 %v2226_v37  ;;  %v300_v37 = vld [vmem:[%s3600_s3 + $0x168] sm:$0xff]  ;;  %v2246_v42 = vpack.c.bf16 %v268_v34, %v267_v33  ;;  %v1704_v29 = vld [vmem:[%s3598_s1 + $0x340] sm:$0xff]  ;;  %v1710_v33 = vld [vmem:[%s3598_s1 + $0x370] sm:$0xff] }
 0x112   :  { %2259 = vmatpush3.bf16.msra.mxu1 %v2258_v38  ;;  %2229 = vmatprep.subr.bf16.mxu0 %v2228_v39  ;;  %v285_v38 = vld [vmem:[%s3600_s3 + $0xf0] sm:$0xff]  ;;  %v286_v39 = vld [vmem:[%s3600_s3 + $0xf8] sm:$0xff]  ;;  %v2278_v44 = vpack.c.bf16 %v300_v37, %v299_v35  ;;  %v1709_v23 = vld [vmem:[%s3598_s1 + $0x368] sm:$0xff] }
 0x113   :  { %2261 = vmatprep.subr.bf16.mxu1 %v2260_v43  ;;  %v88_v43 = vrot.slane %v2977_v54, %v2970_v52  ;;  %v2248_v47 = vpack.c.bf16 %v286_v39, %v285_v38  ;;  %v2292_v28 = vpack.c.bf16 %v1709_v23, %v1705_v22  ;;  %v1713_v34 = vld [vmem:[%s3598_s1 + $0x388] sm:$0xff]  ;;  %v1719_v37 = vld [vmem:[%s3598_s1 + $0x3b8] sm:$0xff]  ;;  %v1783_v8 = vld [vmem:[%s3600_s3 + $0x580] sm:$0xff] }
 0x114   :  { %v1717_v35 = vld [vmem:[%s3598_s1 + $0x3a8] sm:$0xff]  ;;  %v1753_v17 = vld [vmem:[%s3600_s3 + $0x490] sm:$0xff]  ;;  %v1738_v23 = vld [vmem:[%s3600_s3 + $0x418] sm:$0xff] }
 0x115   :  { %2231 = vmatpush3.bf16.msra.mxu0 %v2230_v51  ;;  %v96_v51 = vrot.slane %v2977_v54, %v2979_v55  ;;  %v1695_v54 = vld [vmem:[%s3598_s1 + $0x2f8] sm:$0xff]  ;;  %v176_v63 = vadd.f32 %v2963_v45, %v88_v43  ;;  %v1714_v43 = vld [vmem:[%s3598_s1 + $0x390] sm:$0xff] }
 0x116   :  { %2263 = vmatpush3.bf16.msra.mxu1 %v2262_v57  ;;  %2233 = vmatprep.subr.bf16.mxu0 %v2232_v58  ;;  %v2280_v57 = vpack.c.bf16 %v318_v41, %v317_v40  ;;  %v302_v58 = vld [vmem:[%s3600_s3 + $0x178] sm:$0xff]  ;;  %v2304_v45 = vpack.c.bf16 %v1695_v54, %v1691_v61  ;;  %v2296_v40 = vpack.c.bf16 %v1717_v35, %v1713_v34  ;;  %v1712_v41 = vld [vmem:[%s3598_s1 + $0x380] sm:$0xff]  ;;  %v1737_v22 = vld [vmem:[%s3600_s3 + $0x410] sm:$0xff] }
 0x117   :  { %2265 = vmatprep.subr.bf16.mxu1 %v2264_v62  ;;  %v2250_v62 = vpack.c.bf16 %v270_v49, %v269_v48  ;;  %v2282_v0 = vpack.c.bf16 %v302_v58, %v301_v50  ;;  %v251_v13 = vmax.f32 %v176_v63, 0.0  ;;  %v1721_v48 = vld [vmem:[%s3598_s1 + $0x3c8] sm:$0xff]  ;;  %v1723_v50 = vld [vmem:[%s3598_s1 + $0x3d8] sm:$0xff]  ;;  %v1724_v61 = vld [vmem:[%s3598_s1 + $0x3e0] sm:$0xff] }
 0x118   :  { %v1725_v49 = vld [vmem:[%s3598_s1 + $0x3e8] sm:$0xff]  ;;  %v1726_v63 = vld [vmem:[%s3598_s1 + $0x3f0] sm:$0xff]  ;;  %v1739_v34 = vld [vmem:[%s3600_s3 + $0x420] sm:$0xff] }
 0x119   :  { %2235 = vmatpush3.bf16.msra.mxu0 %v2234_v5  ;;  %v1690_v5 = vld [vmem:[%s3598_s1 + $0x2d0] sm:$0xff]  ;;  %v2300_v59 = vpack.c.bf16 %v1725_v49, %v1721_v48  ;;  %v1740_v35 = vld [vmem:[%s3600_s3 + $0x428] sm:$0xff]  ;;  %v1742_v49 = vld [vmem:[%s3600_s3 + $0x438] sm:$0xff] }
 0x11a   :  { %2267 = vmatpush3.bf16.msra.mxu1 %v2266_v6  ;;  %2237 = vmatprep.subr.bf16.mxu0 %v2236_v7  ;;  %v247_v6 = vadd.f32 %v2965_v46, %v96_v51  ;;  %v1694_v7 = vld [vmem:[%s3598_s1 + $0x2f0] sm:$0xff]  ;;  %v1703_v46 = vld [vmem:[%s3598_s1 + $0x338] sm:$0xff] }
 0x11b   :  { %2269 = vmatprep.subr.bf16.mxu1 %v2268_v11  ;;  %v2286_v11 = vpack.c.bf16 %v1692_v4, %v1688_v2  ;;  %v2306_v14 = vpack.c.bf16 %v1694_v7, %v1690_v5  ;;  %v1727_v51 = vld [vmem:[%s3598_s1 + $0x3f8] sm:$0xff]  ;;  %v1729_v2 = vld [vmem:[%s3598_s1 + $0x408] sm:$0xff]  ;;  %v1728_v5 = vld [vmem:[%s3598_s1 + $0x400] sm:$0xff] }
 0x11c   :  { %v2320_v54 = vpack.c.bf16 %v1727_v51, %v1723_v50  ;;  %v1731_v4 = vld [vmem:[%s3598_s1 + $0x418] sm:$0xff]  ;;  %v1752_v7 = vld [vmem:[%s3600_s3 + $0x488] sm:$0xff]  ;;  %v1741_v48 = vld [vmem:[%s3600_s3 + $0x430] sm:$0xff] }
 0x11d   :  { %2239 = vmatpush3.bf16.msra.mxu0 %v2238_v18  ;;  %v1698_v18 = vld [vmem:[%s3598_s1 + $0x310] sm:$0xff]  ;;  %v2338_v51 = vpack.c.bf16 %v1742_v49, %v1741_v48 }
 0x11e   :  { %2271 = vmatpush3.bf16.msra.mxu1 %v2270_v19  ;;  %2241 = vmatprep.subr.bf16.mxu0 %v2240_v20  ;;  %v253_v19 = vmax.f32 %v247_v6, 0.0  ;;  %v2308_v20 = vpack.c.bf16 %v1703_v46, %v1699_v10  ;;  %v2310_v27 = vpack.c.bf16 %v1702_v21, %v1698_v18  ;;  %v1730_v6 = vld [vmem:[%s3598_s1 + $0x410] sm:$0xff]  ;;  %v1784_v10 = vld [vmem:[%s3600_s3 + $0x588] sm:$0xff]  ;;  %v1754_v18 = vld [vmem:[%s3600_s3 + $0x498] sm:$0xff] }
 0x11f   :  { %2273 = vmatprep.subr.bf16.mxu1 %v2272_v24  ;;  %v1707_v24 = vld [vmem:[%s3598_s1 + $0x358] sm:$0xff]  ;;  %v1736_v46 = vld [vmem:[%s3600_s3 + $0x408] sm:$0xff] }
 0x120   :  { %v1786_v21 = vld [vmem:[%s3600_s3 + $0x598] sm:$0xff] }
 0x121   :  { %2243 = vmatpush3.bf16.msra.mxu0 %v2242_v30  ;;  %v1708_v30 = vld [vmem:[%s3598_s1 + $0x360] sm:$0xff] }
 0x122   :  { %2275 = vmatpush3.bf16.msra.mxu1 %v2274_v31  ;;  %2245 = vmatprep.subr.bf16.mxu0 %v2244_v32  ;;  %v1706_v31 = vld [vmem:[%s3598_s1 + $0x350] sm:$0xff]  ;;  %v2312_v32 = vpack.c.bf16 %v1711_v25, %v1707_v24  ;;  %v2294_v38 = vpack.c.bf16 %v1708_v30, %v1704_v29  ;;  %v2330_v25 = vpack.c.bf16 %v1738_v23, %v1737_v22  ;;  %v1755_v29 = vld [vmem:[%s3600_s3 + $0x4a0] sm:$0xff]  ;;  %v1756_v30 = vld [vmem:[%s3600_s3 + $0x4a8] sm:$0xff] }
 0x123   :  { %2277 = vmatprep.subr.bf16.mxu1 %v2276_v36  ;;  %v1715_v36 = vld [vmem:[%s3598_s1 + $0x398] sm:$0xff]  ;;  %v2314_v39 = vpack.c.bf16 %v1710_v33, %v1706_v31  ;;  %v1787_v31 = vld [vmem:[%s3600_s3 + $0x5a0] sm:$0xff]  ;;  %v1788_v33 = vld [vmem:[%s3600_s3 + $0x5a8] sm:$0xff] }
 0x125   :  { %2247 = vmatpush3.bf16.msra.mxu0 %v2246_v42  ;;  %v1716_v42 = vld [vmem:[%s3598_s1 + $0x3a0] sm:$0xff] }
 0x126   :  { %2279 = vmatpush3.bf16.msra.mxu1 %v2278_v44  ;;  %2249 = vmatprep.subr.bf16.mxu0 %v2248_v47  ;;  %v2316_v44 = vpack.c.bf16 %v1719_v37, %v1715_v36  ;;  %v1718_v47 = vld [vmem:[%s3598_s1 + $0x3b0] sm:$0xff]  ;;  %v2364_v36 = vpack.c.bf16 %v1788_v33, %v1787_v31  ;;  %v2334_v37 = vpack.c.bf16 %v1740_v35, %v1739_v34  ;;  %v1766_v31 = vld [vmem:[%s3600_s3 + $0x4f8] sm:$0xff] }
 0x127   :  { %2281 = vmatprep.subr.bf16.mxu1 %v2280_v57  ;;  %v2298_v57 = vpack.c.bf16 %v1716_v42, %v1712_v41  ;;  %v2318_v58 = vpack.c.bf16 %v1718_v47, %v1714_v43  ;;  %v1757_v41 = vld [vmem:[%s3600_s3 + $0x4b0] sm:$0xff]  ;;  %v1758_v42 = vld [vmem:[%s3600_s3 + $0x4b8] sm:$0xff] }
 0x128   :  { %v1789_v43 = vld [vmem:[%s3600_s3 + $0x5b0] sm:$0xff]  ;;  %v1790_v47 = vld [vmem:[%s3600_s3 + $0x5b8] sm:$0xff] }
 0x129   :  { %2251 = vmatpush3.bf16.msra.mxu0 %v2250_v62  ;;  %v1722_v62 = vld [vmem:[%s3598_s1 + $0x3d0] sm:$0xff]  ;;  %v2368_v50 = vpack.c.bf16 %v1790_v47, %v1789_v43  ;;  %v1798_v34 = vld [vmem:[%s3600_s3 + $0x5f8] sm:$0xff] }
 0x12a   :  { %2283 = vmatpush3.bf16.msra.mxu1 %v2282_v0  ;;  %2285 = vmatprep.subr.bf16.mxu0 %v2284_v1  ;;  %v2302_v0 = vpack.c.bf16 %v1724_v61, %v1720_v60  ;;  %v2322_v1 = vpack.c.bf16 %v1726_v63, %v1722_v62  ;;  %v1760_v61 = vld [vmem:[%s3600_s3 + $0x4c8] sm:$0xff]  ;;  %v1749_v35 = vld [vmem:[%s3600_s3 + $0x470] sm:$0xff] }
 0x12b   :  { %2305 = vmatprep.subr.bf16.mxu1 %v2304_v45  ;;  %v1751_v45 = vld [vmem:[%s3600_s3 + $0x480] sm:$0xff]  ;;  %v1792_v62 = vld [vmem:[%s3600_s3 + $0x5c8] sm:$0xff] }
 0x12c   :  { %803 = vmatmul.mubr.f32.vlgmr.msra.gmra.mrb[6].mxu0 %v251_v13  ;;  %v2324_v9 = vpack.c.bf16 %v1752_v7, %v1751_v45  ;;  %v1761_v45 = vld [vmem:[%s3600_s3 + $0x4d0] sm:$0xff]  ;;  %v1762_v7 = vld [vmem:[%s3600_s3 + $0x4d8] sm:$0xff] }
 0x12d   :  { %873 = vmatmul.mubr.f32.vlgmr.msra.gmra.mrb[6].mxu1 %v253_v19  ;;  %2287 = vmatpush1.bf16.msra.mxu0 %v2286_v11  ;;  %v2356_v11 = vpack.c.bf16 %v1784_v10, %v1783_v8  ;;  %v1785_v19 = vld [vmem:[%s3600_s3 + $0x590] sm:$0xff] }
 0x12e   :  { %2307 = vmatpush1.bf16.msra.mxu1 %v2306_v14  ;;  %2289 = vmatprep.subr.bf16.mxu0 %v2288_v15  ;;  %v1767_v14 = vld [vmem:[%s3600_s3 + $0x500] sm:$0xff]  ;;  %v1768_v15 = vld [vmem:[%s3600_s3 + $0x508] sm:$0xff]  ;;  %v2360_v24 = vpack.c.bf16 %v1786_v21, %v1785_v19  ;;  %v1793_v10 = vld [vmem:[%s3600_s3 + $0x5d0] sm:$0xff] }
 0x12f   :  { %2309 = vmatprep.subr.bf16.mxu1 %v2308_v20  ;;  %1010 = vmatprep.mubr.f32.mxu0 %v2414_v3  ;;  %v2358_v16 = vpack.c.bf16 %v1768_v15, %v1767_v14  ;;  %v2328_v20 = vpack.c.bf16 %v1754_v18, %v1753_v17  ;;  %v1777_v14 = vld [vmem:[%s3600_s3 + $0x550] sm:$0xff]  ;;  %v1778_v15 = vld [vmem:[%s3600_s3 + $0x558] sm:$0xff]  ;;  %v1764_v17 = vld [vmem:[%s3600_s3 + $0x4e8] sm:$0xff] }
 0x130   :  { %1081 = vmatprep.mubr.f32.mxu1 %v2414_v3  ;;  %v1795_v18 = vld [vmem:[%s3600_s3 + $0x5e0] sm:$0xff]  ;;  %v2378_v21 = vpack.c.bf16 %v1778_v15, %v1777_v14  ;;  %v1309_v14 = vld [vmem:[%s3602_s5 + $0x10] sm:$0xff]  ;;  %v1310_v15 = vld [vmem:[%s3602_s5 + $0x18] sm:$0xff] }
 0x131   :  { %2291 = vmatpush1.bf16.msra.mxu0 %v2290_v26  ;;  %v1769_v26 = vld [vmem:[%s3600_s3 + $0x510] sm:$0xff] }
 0x132   :  { %2311 = vmatpush1.bf16.msra.mxu1 %v2310_v27  ;;  %2293 = vmatprep.subr.bf16.mxu0 %v2292_v28  ;;  %v1770_v27 = vld [vmem:[%s3600_s3 + $0x518] sm:$0xff] }
 0x133   :  { %2313 = vmatprep.subr.bf16.mxu1 %v2312_v32  ;;  %v2362_v28 = vpack.c.bf16 %v1770_v27, %v1769_v26  ;;  %v2332_v32 = vpack.c.bf16 %v1756_v30, %v1755_v29  ;;  %v1779_v26 = vld [vmem:[%s3600_s3 + $0x560] sm:$0xff]  ;;  %v1765_v30 = vld [vmem:[%s3600_s3 + $0x4f0] sm:$0xff] }
 0x134   :  { %v2352_v33 = vpack.c.bf16 %v1766_v31, %v1765_v30 }
 0x135   :  { %2295 = vmatpush1.bf16.msra.mxu0 %v2294_v38  ;;  %v1771_v38 = vld [vmem:[%s3600_s3 + $0x520] sm:$0xff] }
 0x136   :  { %2315 = vmatpush1.bf16.msra.mxu1 %v2314_v39  ;;  %2297 = vmatprep.subr.bf16.mxu0 %v2296_v40  ;;  %v1772_v39 = vld [vmem:[%s3600_s3 + $0x528] sm:$0xff] }
 0x137   :  { %2317 = vmatprep.subr.bf16.mxu1 %v2316_v44  ;;  %v2366_v40 = vpack.c.bf16 %v1772_v39, %v1771_v38  ;;  %v2336_v44 = vpack.c.bf16 %v1758_v42, %v1757_v41  ;;  %v1781_v39 = vld [vmem:[%s3600_s3 + $0x570] sm:$0xff]  ;;  %v2415_v42 = vmov 0.0|0.0  }
 0x139   :  { %2299 = vmatpush1.bf16.msra.mxu0 %v2298_v57  ;;  %v1773_v57 = vld [vmem:[%s3600_s3 + $0x530] sm:$0xff] }
 0x13a   :  { %2319 = vmatpush1.bf16.msra.mxu1 %v2318_v58  ;;  %2301 = vmatprep.subr.bf16.mxu0 %v2300_v59  ;;  %v1774_v58 = vld [vmem:[%s3600_s3 + $0x538] sm:$0xff]  ;;  %v1759_v59 = vld [vmem:[%s3600_s3 + $0x4c0] sm:$0xff] }
 0x13b   :  { %2321 = vmatprep.subr.bf16.mxu1 %v2320_v54  ;;  %v2370_v60 = vpack.c.bf16 %v1774_v58, %v1773_v57  ;;  %v1791_v54 = vld [vmem:[%s3600_s3 + $0x5c0] sm:$0xff]  ;;  %v2340_v63 = vpack.c.bf16 %v1760_v61, %v1759_v59 }
 0x13d   :  { %2303 = vmatpush1.bf16.msra.mxu0 %v2302_v0  ;;  %v2372_v0 = vpack.c.bf16 %v1792_v62, %v1791_v54 }
 0x13e   :  { %2323 = vmatpush1.bf16.msra.mxu1 %v2322_v1  ;;  %966 = vmatprep.subr.mxu0 %v1729_v2  ;;  %v1743_v1 = vld [vmem:[%s3600_s3 + $0x440] sm:$0xff]  ;;  %v1744_v2 = vld [vmem:[%s3600_s3 + $0x448] sm:$0xff] }
 0x13f   :  { %1037 = vmatprep.subr.mxu1 %v1731_v4  ;;  %v1775_v4 = vld [vmem:[%s3600_s3 + $0x540] sm:$0xff] }
 0x141   :  { %967 = vmatpush1.msra.mxu0 %v1728_v5  ;;  %v2342_v5 = vpack.c.bf16 %v1744_v2, %v1743_v1 }
 0x142   :  { %1038 = vmatpush1.msra.mxu1 %v1730_v6  ;;  %1733 = vmatmul.mubr.msk.f32.vlgmr.msra.gmra.mrb[8].mxu0 %vm105_vm0, %v2645_v12  ;;  %v1776_v6 = vld [vmem:[%s3600_s3 + $0x548] sm:$0xff] }
 0x143   :  { %1734 = vmatmul.mubr.msk.f32.vlgmr.msra.gmra.mrb[8].mxu1 %vm105_vm0, %v2645_v12  ;;  %v1735_v12 = vld [vmem:[%s3600_s3 + $0x400] sm:$0xff]  ;;  %2325 = vmatprep.subr.bf16.mxu0 %v2324_v9  ;;  %v2374_v8 = vpack.c.bf16 %v1776_v6, %v1775_v4  ;;  %v2344_v9 = vpack.c.bf16 %v1762_v7, %v1761_v45 }
 0x144   :  { %v2326_v13 = vpack.c.bf16 %v1736_v46, %v1735_v12  ;;  %2357 = vmatprep.subr.bf16.mxu1 %v2356_v11  ;;  %v1794_v12 = vld [vmem:[%s3600_s3 + $0x5d8] sm:$0xff]  ;;  %v1745_v46 = vld [vmem:[%s3600_s3 + $0x450] sm:$0xff] }
 0x145   :  { %2359 = vmatpush3.bf16.msra.mxu1 %v2358_v16  ;;  %v2376_v11 = vpack.c.bf16 %v1794_v12, %v1793_v10  ;;  %v1763_v16 = vld [vmem:[%s3600_s3 + $0x4e0] sm:$0xff]  ;;  %v1308_v10 = vld [vmem:[%s3602_s5 + $0x8] sm:$0xff] }
 0x146   :  { %2327 = vmatpush3.bf16.msra.mxu0 %v2326_v13  ;;  %2361 = vmatprep.subr.bf16.mxu1 %v2360_v24  ;;  %v1746_v13 = vld [vmem:[%s3600_s3 + $0x458] sm:$0xff]  ;;  %v2348_v22 = vpack.c.bf16 %v1764_v17, %v1763_v16  ;;  %v1747_v24 = vld [vmem:[%s3600_s3 + $0x460] sm:$0xff]  ;;  %v2392_v17 = vpack.c.bf16 %v1310_v15, %v1309_v14 }
 0x147   :  { %2329 = vmatprep.subr.bf16.mxu0 %v2328_v20  ;;  %v2346_v19 = vpack.c.bf16 %v1746_v13, %v1745_v46  ;;  %v1796_v20 = vld [vmem:[%s3600_s3 + $0x5e8] sm:$0xff] }
 0x148   :  { %v2380_v23 = vpack.c.bf16 %v1796_v20, %v1795_v18  ;;  %v1311_v18 = vld [vmem:[%s3602_s5 + $0x20] sm:$0xff] }
 0x149   :  { %2363 = vmatpush3.bf16.msra.mxu1 %v2362_v28  ;;  %v1780_v28 = vld [vmem:[%s3600_s3 + $0x568] sm:$0xff] }
 0x14a   :  { %2331 = vmatpush3.bf16.msra.mxu0 %v2330_v25  ;;  %2365 = vmatprep.subr.bf16.mxu1 %v2364_v36  ;;  %v1748_v25 = vld [vmem:[%s3600_s3 + $0x468] sm:$0xff]  ;;  %v2382_v29 = vpack.c.bf16 %v1780_v28, %v1779_v26  ;;  %v1750_v36 = vld [vmem:[%s3600_s3 + $0x478] sm:$0xff] }
 0x14b   :  { %2333 = vmatprep.subr.bf16.mxu0 %v2332_v32  ;;  %v2350_v27 = vpack.c.bf16 %v1748_v25, %v1747_v24  ;;  %v1797_v32 = vld [vmem:[%s3600_s3 + $0x5f0] sm:$0xff]  ;;  %v2354_v38 = vpack.c.bf16 %v1750_v36, %v1749_v35  ;;  %v1315_v24 = vld [vmem:[%s3602_s5 + $0x40] sm:$0xff]  ;;  %v1316_v25 = vld [vmem:[%s3602_s5 + $0x48] sm:$0xff] }
 0x14c   :  { %v2401_v26 = vpack.c.bf16 %v1316_v25, %v1315_v24  ;;  %v1400_v28 = vld [vmem:[%s3603_s7 + $0x8] sm:$0xff] }
 0x14d   :  { %2367 = vmatpush3.bf16.msra.mxu1 %v2366_v40  ;;  %v1782_v40 = vld [vmem:[%s3600_s3 + $0x578] sm:$0xff] }
 0x14e   :  { %2335 = vmatpush3.bf16.msra.mxu0 %v2334_v37  ;;  %2369 = vmatprep.subr.bf16.mxu1 %v2368_v50  ;;  %v2384_v37 = vpack.c.bf16 %v1798_v34, %v1797_v32  ;;  %v2386_v41 = vpack.c.bf16 %v1782_v40, %v1781_v39 }
 0x14f   :  { %2337 = vmatprep.subr.bf16.mxu0 %v2336_v44 }
 0x151   :  { %2371 = vmatpush3.bf16.msra.mxu1 %v2370_v60 }
 0x152   :  { %2339 = vmatpush3.bf16.msra.mxu0 %v2338_v51  ;;  %2373 = vmatprep.subr.bf16.mxu1 %v2372_v0  ;;  %v1732_v0 = vld [vmem:[%s3601_s2 + $0x8] sm:$0xf] }
 0x153   :  { %2341 = vmatprep.subr.bf16.mxu0 %v2340_v63  ;;  %v929_v1 = vrot.slane %v1732_v0, %v2970_v52  ;;  %v937_v2 = vrot.slane %v1732_v0, %v2979_v55  ;;  %v933_v4 = vrot.slane %v1732_v0, %v2972_v53 }
 0x155   :  { %2375 = vmatpush3.bf16.msra.mxu1 %v2374_v8 }
 0x156   :  { %2343 = vmatpush3.bf16.msra.mxu0 %v2342_v5  ;;  %2377 = vmatprep.subr.bf16.mxu1 %v2376_v11  ;;  %v941_v5 = vrot.slane %v1732_v0, %v2981_v56 }
 0x157   :  { %2345 = vmatprep.subr.bf16.mxu0 %v2344_v9  ;;  %v1307_v9 = vld [vmem:[%s3602_s5] sm:$0xff] }
 0x158   :  { %v2389_v53 = vpack.c.bf16 %v1308_v10, %v1307_v9 }
 0x159   :  { %2379 = vmatpush3.bf16.msra.mxu1 %v2378_v21  ;;  %v1313_v21 = vld [vmem:[%s3602_s5 + $0x30] sm:$0xff] }
 0x15a   :  { %2347 = vmatpush3.bf16.msra.mxu0 %v2346_v19  ;;  %2381 = vmatprep.subr.bf16.mxu1 %v2380_v23  ;;  %v1312_v19 = vld [vmem:[%s3602_s5 + $0x28] sm:$0xff] }
 0x15b   :  { %2349 = vmatprep.subr.bf16.mxu0 %v2348_v22  ;;  %v2395_v20 = vpack.c.bf16 %v1312_v19, %v1311_v18  ;;  %v1314_v22 = vld [vmem:[%s3602_s5 + $0x38] sm:$0xff] }
 0x15c   :  { %v2398_v23 = vpack.c.bf16 %v1314_v22, %v1313_v21 }
 0x15d   :  { %2383 = vmatpush3.bf16.msra.mxu1 %v2382_v29 }
 0x15e   :  { %2351 = vmatpush3.bf16.msra.mxu0 %v2350_v27  ;;  %2385 = vmatprep.subr.bf16.mxu1 %v2384_v37  ;;  %v1399_v27 = vld [vmem:[%s3603_s7] sm:$0xff] }
 0x15f   :  { %2353 = vmatprep.subr.bf16.mxu0 %v2352_v33  ;;  %v2404_v29 = vpack.c.bf16 %v1400_v28, %v1399_v27  ;;  %v1799_v37 = vld [vmem:[%s3604_s4] ss:$0 sm:$0xff] }
 0x161   :  { %2387 = vmatpush3.bf16.msra.mxu1 %v2386_v41  ;;  %v1401_v41 = vld [vmem:[%s3603_s7 + $0x10] sm:$0xff] }
 0x162   :  { %2355 = vmatpush3.bf16.msra.mxu0 %v2354_v38  ;;  %2403 = vmatprep.subr.bf16.mxu1 %v2415_v42 }
 0x163   :  { %2388 = vmatprep.subr.bf16.mxu0 %v2415_v42 }
 0x1df   :  { %v1838_v43 = vpop.f32.mrb[4].mxu0 }
 0x1e0   :  { %v1873_v44 = vpop.f32.mrb[4].mxu1  ;;  %v1839_v47 = vpop.f32.mrb[5].mxu0 }
 0x1e1   :  { %v1840_v48 = vadd.f32 %v1839_v47, %v1838_v43  ;;  %v1874_v49 = vpop.f32.mrb[5].mxu1  ;;  %v1800_v47 = vld [vmem:[%s3605_s6] ss:$0 sm:$0xff] }
 0x1e2   :  { %v1875_v50 = vadd.f32 %v1874_v49, %v1873_v44  ;;  %v1403_v44 = vld [vmem:[%s3603_s7 + $0x20] sm:$0xff] }
 0x1e4   :  { %v735_v51 = vadd.f32 %v1875_v50, %v1840_v48 }
 0x1ff   :  { %v1908_v57 = vpop.f32.mrb[6].mxu0 }
 0x200   :  { %v1943_v58 = vpop.f32.mrb[6].mxu1  ;;  %v1909_v59 = vpop.f32.mrb[7].mxu0 }
 0x201   :  { %v1910_v60 = vadd.f32 %v1909_v59, %v1908_v57  ;;  %v1944_v61 = vpop.f32.mrb[7].mxu1  ;;  %v2417_v57 = vmov 0   ;;  %v1802_v59 = vld [vmem:[%s3607_s8] ss:$0 sm:$0xff] }
 0x202   :  { %v1945_v54 = vadd.f32 %v1944_v61, %v1943_v58  ;;  %2413 = vset.pattern.permute.xlu0 %v2417_v57  ;;  %v1487_v58 = vld [vmem:[%s3606_s10] sm:$0xff] }
 0x203   :  { %v805_v62 = vadd.f32 %v1910_v60, %v735_v51  ;;  %1490 = vperm.xlu0 %2413, %v1487_v58  }
 0x205   :  { %v3509_v63 = vadd.f32 %v1945_v54, %v805_v62 }
 0x215   :  { %v1012_v6 = vpop.f32.mrb[8].mxu0 }
 0x216   :  { %v1013_v45 = vadd.f32 %v1012_v6, %v929_v1  ;;  %v1083_v7 = vpop.f32.mrb[8].mxu1  ;;  %v1014_v8 = vpop.f32.mrb[9].mxu0 }
 0x217   :  { %v1084_v12 = vadd.f32 %v1083_v7, %v937_v2  ;;  %v1015_v52 = vadd.f32 %v1014_v8, %v933_v4  ;;  %v1085_v46 = vpop.f32.mrb[9].mxu1 }
 0x218   :  { %v1086_v55 = vadd.f32 %v1085_v46, %v941_v5  ;;  %v1088_v13 = vmax.f32 %v1013_v45, 0.0 }
 0x219   :  { %v1089_v11 = vmax.f32 %v1015_v52, 0.0  ;;  %v1090_v16 = vmax.f32 %v1084_v12, 0.0 }
 0x21a   :  { %v1091_v56 = vmax.f32 %v1086_v55, 0.0 }
 0x21b   :  { %1221 = vmatprep.mubr.f32.mxu0 %v1089_v11 }
 0x21c   :  { %1291 = vmatprep.mubr.f32.mxu1 %v1091_v56  ;;  %1222 = vmatmul.mubr.f32.vlgmr.msra.gmra.mrb[10].mxu0 %v1088_v13 }
 0x21d   :  { %1292 = vmatmul.mubr.f32.vlgmr.msra.gmra.mrb[10].mxu1 %v1090_v16  ;;  %2390 = vmatpush3.bf16.msra.mxu0 %v2389_v53 }
 0x21e   :  { %2391 = vmatprep.subr.bf16.mxu0 %v2415_v42  ;;  %2055 = vmatprep.mubr.msk.f32.mxu0 %vm2416_vm1, %v2414_v3 }
 0x21f   :  { %2068 = vmatprep.mubr.msk.f32.mxu1 %vm2416_vm1, %v2414_v3  ;;  %2405 = vmatpush3.bf16.msra.mxu1 %v2404_v29 }
 0x220   :  { %2406 = vmatprep.subr.bf16.mxu1 %v2415_v42 }
 0x221   :  { %2393 = vmatpush3.bf16.msra.mxu0 %v2392_v17 }
 0x222   :  { %2394 = vmatprep.subr.bf16.mxu0 %v2415_v42 }
 0x225   :  { %2396 = vmatpush3.bf16.msra.mxu0 %v2395_v20 }
 0x226   :  { %2397 = vmatprep.subr.bf16.mxu0 %v2415_v42 }
 0x229   :  { %2399 = vmatpush3.bf16.msra.mxu0 %v2398_v23 }
 0x22a   :  { %2400 = vmatprep.subr.bf16.mxu0 %v2415_v42  ;;  %v1402_v42 = vld [vmem:[%s3603_s7 + $0x18] sm:$0xff] }
 0x22b   :  { %v2407_v43 = vpack.c.bf16 %v1402_v42, %v1401_v41 }
 0x22d   :  { %2402 = vmatpush3.bf16.msra.mxu0 %v2401_v26  ;;  %2408 = vmatpush3.bf16.msra.mxu1 %v2407_v43 }
 0x22e   :  { %2066 = vmatprep.subr.mxu1 %v2414_v3 }
 0x231   :  { %2067 = vmatpush3.msra.mxu1 %v1403_v44 }
 0x232   :  { %2071 = vmatprep.subr.mxu1 %v2414_v3 }
 0x2ef   :  { %v1978_v30 = vpop.f32.mrb[10].mxu0 }
 0x2f0   :  { %v2013_v31 = vpop.f32.mrb[10].mxu1  ;;  %v1979_v32 = vpop.f32.mrb[11].mxu0 }
 0x2f1   :  { %v1980_v33 = vadd.f32 %v1979_v32, %v1978_v30  ;;  %v2014_v34 = vpop.f32.mrb[11].mxu1 }
 0x2f2   :  { %v2015_v35 = vadd.f32 %v2014_v34, %v2013_v31 }
 0x2f4   :  { %v1294_v36 = vadd.f32 %v2015_v35, %v1980_v33 }
 0x2f6   :  { %v1297_v38 = vadd.f32 %v1294_v36, %v3509_v63  ;;  %v1491_v63 = vpop.permute.xlu0 %1490 }
 0x2f8   :  { %v1305_v39 = vadd.f32 %v1799_v37, %v1297_v38 }
 0x2fa   :  { %v1306_v40 = vmax.f32 %v1305_v39, 0.0 }
 0x2fc   :  { %2056 = vmatmul.mubr.msk.f32.vlgmr.msra.gmra.mrb[12].mxu0 %vm1324_vm2, %v1306_v40 }
 0x3cf   :  { %v1394_v48 = vpop.f32.mrb[12].mxu0 }
 0x3d0   :  { %v1395_v49 = vadd.f32 %v1800_v47, %v1394_v48  ;;  %v2057_v50 = vpop.f32.mrb[13].mxu0 }
 0x3d2   :  { %v1398_v51 = vmax.f32 %v1395_v49, 0.0 }
 0x3d4   :  { %2069 = vmatmul.mubr.msk.f32.vlgmr.msra.gmra.mrb[12].mxu1 %vm1411_vm3, %v1398_v51 }
 0x3d5   :  { %2073 = vmatprep.mubr.msk.f32.mxu1 %vm2416_vm1, %v2414_v3  ;;  %v1486_v3 = vld [vmem:[%s3608_s9] sm:$0xff] }
 0x4a7   :  { %v1481_v60 = vpop.f32.mrb[12].mxu1 }
 0x4a8   :  { %v1482_v61 = vadd.f32 %v1802_v59, %v1481_v60  ;;  %v2070_v54 = vpop.f32.mrb[13].mxu1 }
 0x4aa   :  { %v1485_v62 = vmax.f32 %v1482_v61, 0.0 }
 0x4ac   :  { %2072 = vmatpush3.xpose.msk.msra.mxu1 %vm1411_vm3, %v1485_v62 }
 0x4af   :  { %2074 = vmatmul.mubr.msk.f32.vlgmr.msra.gmra.mrb[14].mxu1 %vm1411_vm3, %v1486_v3 }
 0x582   :  { %v1565_v0 = vpop.f32.mrb[14].mxu1 }
 0x583   :  { %v1566_v1 = vadd.f32 %v1565_v0, %v1491_v63  ;;  %v2075_v2 = vpop.f32.mrb[15].mxu1 }
 0x585   :  { %1570 = vst.msk [vmem:[%s3609_s11] sm:$0xff] %vm1569_vm4, %v1566_v1 }

</bundles_post_ra>
